<compile_context>
chip_gen: v7x
topology: tpu7x:2x2x1
jax: 0.10.0
libtpu: 0.0.40
codegen_flags: <defaults>
</compile_context>

<pallas_src>
import jax
import jax.numpy as jnp
from jax.experimental import pallas as pl
from jax.experimental.pallas import tpu as pltpu


# -----------------------------------------------------------------------------
# Kernel 1: recurrent decoder loop (attention + GRU cell), T_BLK steps per grid
# iteration. Emits the lane-dense state slab [T, B, 2H] (h ++ ctx) in bf16.
# Hidden state is carried across time blocks in VMEM scratch.
# -----------------------------------------------------------------------------
def _decoder_recurrence_kernel(
    emb_ref,     # [T_BLK, Bb, E]   embedded teacher-forced inputs (f32)
    enc_ref,     # [Bb, F, H]       content_selection (encoder outputs, f32)
    h0_ref,      # [Bb, H]          initial decoder hidden (f32)
    w_gru_ref,   # [E+2H, 6H]       fused GRU weight (cols [gi | gh])
    b_gru_ref,   # [1, 6H]          fused GRU bias   (bi ++ bh)
    state_ref,   # [T_BLK, Bb, 2H]  output: h_t ++ ctx_t  (bf16)
    h_scr,       # VMEM [Bb, H]     recurrent hidden carried across time blocks
):
    t_blk = emb_ref.shape[0]
    H = h0_ref.shape[-1]

    # Re-initialize the carry at the first time block of each batch block.
    @pl.when(pl.program_id(1) == 0)
    def _():
        h_scr[...] = h0_ref[...].astype(jnp.float32)

    # Loop-invariant loads hoisted: once per time block, reused T_BLK times.
    enc = enc_ref[...].astype(jnp.float32)          # [Bb, F, H]
    w_gru = w_gru_ref[...]
    b_gru = b_gru_ref[...]

    def step(t, h):
        emb = emb_ref[t].astype(jnp.float32)        # [Bb, E]

        # --- dot-product attention over max_field, on the VPU/XLU path ---
        # (q=1 per step: broadcast-mul + reduce beats B tiny MXU pushes on the
        #  serial critical path; the MXU only carries the fused GRU dot below.)
        scores = jnp.sum(h[:, None, :] * enc, axis=-1)              # [Bb, F]
        scores = scores - jnp.max(scores, axis=-1, keepdims=True)
        p = jnp.exp(scores)
        inv_den = pl.reciprocal(jnp.sum(p, axis=-1, keepdims=True), approx=True)
        attn = p * inv_den                                          # [Bb, F]
        ctx = jnp.sum(attn[:, :, None] * enc, axis=1)               # [Bb, H]

        # --- GRU cell: ONE fused MXU push per step ---
        # gates = [emb ++ ctx ++ h] @ [[wi_e,0],[wi_c,0],[0,wh]] + [bi ++ bh]
        x = jnp.concatenate([emb, ctx, h], axis=-1)                 # [Bb, E+2H]
        gates = jnp.dot(x, w_gru, preferred_element_type=jnp.float32) + b_gru
        gi = gates[:, :3 * H]
        gh = gates[:, 3 * H:]
        r = jax.nn.sigmoid(gi[:, :H] + gh[:, :H])
        z = jax.nn.sigmoid(gi[:, H:2 * H] + gh[:, H:2 * H])
        n = jnp.tanh(gi[:, 2 * H:] + r * gh[:, 2 * H:])
        h_new = (1.0 - z) * n + z * h                               # [Bb, H]

        # Lane-dense write: one store of the 2H-wide row per step.
        state_ref[t] = jnp.concatenate([h_new, ctx], axis=-1).astype(
            state_ref.dtype)
        return h_new

    unroll = t_blk if t_blk <= 8 else 8   # partial unroll: LLO visibility
    h_last = jax.lax.fori_loop(0, t_blk, step, h_scr[...], unroll=unroll)
    h_scr[...] = h_last


def decoder_recurrence_pallas(tgt_emb_tmajor, content_selection, h0, params,
                              t_blk_cap=32):
    """tgt_emb_tmajor: [T, B, E]; content_selection: [B, F, H]; h0: [B, H].

    Returns lane-dense states [T, B, 2H] (bf16) with h at [..., :H], ctx at
    [..., H:] — matching the row order of concat(wo_h, wo_c).
    """
    T, B, E = tgt_emb_tmajor.shape
    _, Fdim, H = content_selection.shape

    # cdiv-based time blocking (+ zero-padded tail) so t_blk stays near the cap
    # regardless of T's factorization.
    n_tblocks = pl.cdiv(T, t_blk_cap)
    t_blk = pl.cdiv(T, n_tblocks)
    Tp = n_tblocks * t_blk
    if Tp != T:
        tgt_emb_tmajor = jnp.pad(tgt_emb_tmajor,
                                 ((0, Tp - T), (0, 0), (0, 0)))

    # Optional batch-parallel axis (v7x megacore). Only split when both halves
    # keep aligned sublane counts (>=16 rows) so the (8,128)/bf16 tiling holds.
    b_blk = B // 2 if (B % 32 == 0) else B
    n_bblocks = B // b_blk

    f32, bf16 = 4, 2
    est = (2 * t_blk * b_blk * E * f32            # emb block (double-buffered)
           + 2 * b_blk * Fdim * H * f32           # enc
           + 2 * b_blk * H * f32                  # h0
           + 2 * (E + 2 * H) * 6 * H * f32        # fused GRU weight
           + 2 * 6 * H * f32                      # fused GRU bias
           + 2 * t_blk * b_blk * 2 * H * bf16     # state out block
           + b_blk * H * f32)                     # scratch carry
    vmem_limit = min(64 * 1024 * 1024, int(est * 1.5) + (4 << 20))

    inv = lambda shape: pl.BlockSpec(shape, lambda bb, tb: (0,) * len(shape))

    grid_spec = pltpu.PrefetchScalarGridSpec(
        num_scalar_prefetch=0,
        grid=(n_bblocks, n_tblocks),
        in_specs=[
            pl.BlockSpec((t_blk, b_blk, E), lambda bb, tb: (tb, bb, 0)),  # emb
            pl.BlockSpec((b_blk, Fdim, H), lambda bb, tb: (bb, 0, 0)),    # enc
            pl.BlockSpec((b_blk, H), lambda bb, tb: (bb, 0)),             # h0
            inv((E + 2 * H, 6 * H)),                                      # w_gru
            inv((1, 6 * H)),                                              # b_gru
        ],
        out_specs=pl.BlockSpec((t_blk, b_blk, 2 * H),
                               lambda bb, tb: (tb, bb, 0)),
        scratch_shapes=[pltpu.VMEM((b_blk, H), jnp.float32)],
    )

    states = pl.pallas_call(
        _decoder_recurrence_kernel,
        out_shape=jax.ShapeDtypeStruct((Tp, B, 2 * H), jnp.bfloat16),
        grid_spec=grid_spec,
        compiler_params=pltpu.CompilerParams(
            # batch blocks independent (megacore), time blocks sequential carry
            dimension_semantics=("parallel", "arbitrary"),
            vmem_limit_bytes=vmem_limit),
    )(
        tgt_emb_tmajor, content_selection, h0,
        params["w_gru"], params["b_gru"],
    )
    return states[:T] if Tp != T else states


# -----------------------------------------------------------------------------
# Kernel 2: vocab projection  logits = [h ++ ctx] @ concat(wo_h, wo_c) + bo
# Lane-dense, V padded to 128, bf16 operands with f32 accumulation.
# Grid order: V OUTER so the (dominant) weight stream is read from HBM once.
# -----------------------------------------------------------------------------
def _vocab_proj_kernel(s_ref, w_ref, b_ref, o_ref):
    o_ref[...] = (jnp.dot(s_ref[...], w_ref[...],
                          preferred_element_type=jnp.float32)
                  + b_ref[...]).astype(o_ref.dtype)


def vocab_projection_pallas(states2d_bf16, wo_full_bf16, bo_pad, v_out):
    """states2d_bf16: [M=T*B, 2H] bf16; wo_full_bf16: [2H, Vp] bf16;
    bo_pad: [1, Vp] f32.  Returns logits [M, v_out] f32."""
    m, two_h = states2d_bf16.shape
    vp = wo_full_bf16.shape[1]

    # Row tiling: 256-row tiles when large (megacore-shardable), else one tile.
    if m % 256 == 0:
        mp, tm = m, 256
    elif m > 256:
        mp, tm = pl.cdiv(m, 256) * 256, 256
    else:
        mp, tm = m, m
    if mp != m:
        states2d_bf16 = jnp.pad(states2d_bf16, ((0, mp - m), (0, 0)))

    # Largest lane-dense vocab tile that divides Vp.
    tn = next(c for c in (1024, 512, 256, 128) if vp % c == 0)

    est = 2 * (tm * two_h * 2 + two_h * tn * 2 + tn * 4 + tm * tn * 4)
    vmem_limit = min(64 * 1024 * 1024, int(est * 1.5) + (4 << 20))

    out = pl.pallas_call(
        _vocab_proj_kernel,
        out_shape=jax.ShapeDtypeStruct((mp, vp), jnp.float32),
        grid_spec=pltpu.PrefetchScalarGridSpec(
            num_scalar_prefetch=0,
            grid=(vp // tn, mp // tm),   # V outer: W tile streamed exactly once
            in_specs=[
                pl.BlockSpec((tm, two_h), lambda j, i: (i, 0)),
                pl.BlockSpec((two_h, tn), lambda j, i: (0, j)),
                pl.BlockSpec((1, tn), lambda j, i: (0, j)),
            ],
            out_specs=pl.BlockSpec((tm, tn), lambda j, i: (i, j)),
        ),
        compiler_params=pltpu.CompilerParams(
            dimension_semantics=("parallel", "parallel"),
            vmem_limit_bytes=vmem_limit),
    )(states2d_bf16, wo_full_bf16, bo_pad)
    return out[:m, :v_out]


# -----------------------------------------------------------------------------
# One-time parameter preparation (fused GRU weight, concatenated/padded vocab
# weight in bf16). Hoisted out of the per-step forward path.
# -----------------------------------------------------------------------------
def prepare_params(params):
    E = params["wi_e"].shape[0]
    H = params["wi_c"].shape[0]
    V = params["wo_h"].shape[1]

    w_gru = jnp.zeros((E + 2 * H, 6 * H), jnp.float32)
    w_gru = w_gru.at[:E, :3 * H].set(params["wi_e"])
    w_gru = w_gru.at[E:E + H, :3 * H].set(params["wi_c"])
    w_gru = w_gru.at[E + H:, 3 * H:].set(params["wh"])
    b_gru = jnp.concatenate([params["bi"], params["bh"]], axis=-1)   # [1, 6H]

    vp = pl.cdiv(V, 128) * 128
    wo_full = jnp.concatenate([params["wo_h"], params["wo_c"]], axis=0)  # [2H,V]
    wo_full = jnp.pad(wo_full, ((0, 0), (0, vp - V))).astype(jnp.bfloat16)
    bo_pad = jnp.pad(params["bo"], ((0, 0), (0, vp - V)))                # f32

    out = dict(params)
    out.update(w_gru=w_gru, b_gru=b_gru, wo_full_bf16=wo_full,
               bo_pad=bo_pad, V=V)
    return out


# -----------------------------------------------------------------------------
# Table2Text forward (train_mode=True): encoder glue in JAX, decoder in Pallas.
# -----------------------------------------------------------------------------
def table2text_forward_train(seq_input, seq_target, params, max_len):
    # ----- encoder (glue): embedding + projection over the table fields -----
    enc_emb = params["enc_emb"][seq_input]                         # [B, F, E]
    content_selection = jnp.tanh(
        jnp.einsum("bfe,eh->bfh", enc_emb, params["enc_proj"]) + params["enc_b"])
    decoder_hidden = jnp.tanh(
        jnp.mean(content_selection, axis=1) @ params["w_h0"])      # [B, H]

    # ----- decoder input embedding (teacher forcing) -----
    tgt_emb = params["dec_emb"][seq_target[:, :max_len]]           # [B, T, E]
    tgt_emb_tmajor = jnp.transpose(tgt_emb, (1, 0, 2))             # [T, B, E]

    # ----- Pallas kernel 1: recurrent attention-GRU loop -----
    states = decoder_recurrence_pallas(tgt_emb_tmajor, content_selection,
                                       decoder_hidden, params)    # [T,B,2H] bf16
    T, B, two_h = states.shape
    states2d = states.reshape(T * B, two_h)                        # [T*B, 2H]

    # ----- Pallas kernel 2: lane-dense vocab projection (W streamed once) -----
    logits2d = vocab_projection_pallas(states2d, params["wo_full_bf16"],
                                       params["bo_pad"], params["V"])
    V = params["V"]

    # back to PyTorch convention [batch, max_len, output_dim]
    return jnp.transpose(logits2d.reshape(T, B, V), (1, 0, 2))


# plain-JAX reference of the same decoder loop (for a sanity check)
def _reference_forward(seq_input, seq_target, params, max_len):
    enc_emb = params["enc_emb"][seq_input]
    enc = jnp.tanh(jnp.einsum("bfe,eh->bfh", enc_emb, params["enc_proj"])
                   + params["enc_b"])
    h = jnp.tanh(jnp.mean(enc, axis=1) @ params["w_h0"])
    tgt_emb = params["dec_emb"][seq_target[:, :max_len]]
    H = h.shape[-1]
    outs = []
    for t in range(max_len):
        emb = tgt_emb[:, t]
        scores = jnp.sum(h[:, None, :] * enc, axis=-1)
        scores = scores - jnp.max(scores, axis=-1, keepdims=True)
        p = jnp.exp(scores)
        attn = p / jnp.sum(p, axis=-1, keepdims=True)
        ctx = jnp.sum(attn[:, :, None] * enc, axis=1)
        gi = emb @ params["wi_e"] + ctx @ params["wi_c"] + params["bi"]
        gh = h @ params["wh"] + params["bh"]
        r = jax.nn.sigmoid(gi[:, :H] + gh[:, :H])
        z = jax.nn.sigmoid(gi[:, H:2 * H] + gh[:, H:2 * H])
        n = jnp.tanh(gi[:, 2 * H:] + r * gh[:, 2 * H:])
        h = (1.0 - z) * n + z * h
        outs.append(h @ params["wo_h"] + ctx @ params["wo_c"] + params["bo"])
    return jnp.stack(outs, axis=1)


def init_params(key, vocab, E, H, V):
    ks = jax.random.split(key, 12)
    s = 0.1
    return {
        "enc_emb": s * jax.random.normal(ks[0], (vocab, E), jnp.float32),
        "enc_proj": s * jax.random.normal(ks[1], (E, H), jnp.float32),
        "enc_b": jnp.zeros((H,), jnp.float32),
        "w_h0": s * jax.random.normal(ks[2], (H, H), jnp.float32),
        "dec_emb": s * jax.random.normal(ks[3], (vocab, E), jnp.float32),
        "wi_e": s * jax.random.normal(ks[4], (E, 3 * H), jnp.float32),
        "wi_c": s * jax.random.normal(ks[5], (H, 3 * H), jnp.float32),
        "bi": s * jax.random.normal(ks[6], (1, 3 * H), jnp.float32),
        "wh": s * jax.random.normal(ks[7], (H, 3 * H), jnp.float32),
        "bh": s * jax.random.normal(ks[8], (1, 3 * H), jnp.float32),
        "wo_h": s * jax.random.normal(ks[9], (H, V), jnp.float32),
        "wo_c": s * jax.random.normal(ks[10], (H, V), jnp.float32),
        "bo": s * jax.random.normal(ks[11], (1, V), jnp.float32),
    }


if __name__ == "__main__":
    # small shapes consistent with the module's forward
    B = 2          # batch
    MAX_FIELD = 8  # table fields (attention length)
    MAX_LEN = 8    # decode timesteps
    E = 16         # embedding dim
    H = 32         # decoder hidden dim
    V = 32         # decoder.output_dim (vocab logits)
    VOCAB = 50

    key = jax.random.PRNGKey(0)
    k_p, k_in, k_tgt = jax.random.split(key, 3)
    params = prepare_params(init_params(k_p, VOCAB, E, H, V))

    seq_input = jax.random.randint(k_in, (B, MAX_FIELD), 0, VOCAB, jnp.int32)
    seq_target = jax.random.randint(k_tgt, (B, MAX_LEN), 0, VOCAB, jnp.int32)

    seq_output = table2text_forward_train(seq_input, seq_target, params, MAX_LEN)
    seq_output = jax.block_until_ready(seq_output)

    assert seq_output.shape == (B, MAX_LEN, V)
    ref = _reference_forward(seq_input, seq_target, params, MAX_LEN)
    assert jnp.allclose(seq_output, ref, atol=2e-2, rtol=2e-2)

    print("KERNEL_OK")
</pallas_src>

<mosaic_0001>
module attributes {stable_mosaic.version = 11 : i64} {
  func.func @_decoder_recurrence_kernel(%arg0: i32, %arg1: i32, %arg2: memref<8x2x16xf32, #tpu.memory_space<vmem>>, %arg3: memref<2x8x32xf32, #tpu.memory_space<vmem>>, %arg4: memref<2x32xf32, #tpu.memory_space<vmem>>, %arg5: memref<80x192xf32, #tpu.memory_space<vmem>>, %arg6: memref<1x192xf32, #tpu.memory_space<vmem>>, %arg7: memref<8x2x64xbf16, #tpu.memory_space<vmem>>, %arg8: memref<2x32xf32, #tpu.memory_space<vmem>>) attributes {dimension_semantics = [#tpu.dimension_semantics<parallel>, #tpu.dimension_semantics<arbitrary>], iteration_bounds = array<i64: 1, 1>, scalar_prefetch = 0 : i64, scratch_operands = 1 : i64, tpu.core_type = #tpu.core_type<tc>, window_params = [{transform_indices = @transform_0, window_bounds = array<i64: 8, 2, 16>}, {transform_indices = @transform_1, window_bounds = array<i64: 2, 8, 32>}, {transform_indices = @transform_2, window_bounds = array<i64: 2, 32>}, {pipeline_mode = #tpu.pipeline_mode<synchronous>, transform_indices = @transform_3, window_bounds = array<i64: 80, 192>}, {pipeline_mode = #tpu.pipeline_mode<synchronous>, transform_indices = @transform_4, window_bounds = array<i64: 1, 192>}, {transform_indices = @transform_5, window_bounds = array<i64: 8, 2, 64>}]} {
    %c0_i32 = arith.constant 0 : i32
    %0 = arith.cmpi eq, %arg1, %c0_i32 : i32
    %1 = arith.extui %0 : i1 to i32
    %c0_i32_0 = arith.constant 0 : i32
    %2 = arith.cmpi ne, %1, %c0_i32_0 : i32
    scf.if %2 {
      %c0_107 = arith.constant 0 : index
      %c0_108 = arith.constant 0 : index
      %480 = vector.load %arg4[%c0_107, %c0_108] : memref<2x32xf32, #tpu.memory_space<vmem>>, vector<2x32xf32>
      %c0_109 = arith.constant 0 : index
      %c0_110 = arith.constant 0 : index
      %481 = vector.load %arg8[%c0_109, %c0_110] : memref<2x32xf32, #tpu.memory_space<vmem>>, vector<2x32xf32>
      tpu.vector_store %arg8[%c0_109, %c0_110], %480 {strides = array<i32>} : memref<2x32xf32, #tpu.memory_space<vmem>>, vector<2x32xf32>,
    } else {
    }
    %c0 = arith.constant 0 : index
    %c0_1 = arith.constant 0 : index
    %c0_2 = arith.constant 0 : index
    %3 = vector.load %arg3[%c0, %c0_1, %c0_2] : memref<2x8x32xf32, #tpu.memory_space<vmem>>, vector<2x8x32xf32>
    %c0_3 = arith.constant 0 : index
    %c0_4 = arith.constant 0 : index
    %4 = vector.load %arg5[%c0_3, %c0_4] : memref<80x192xf32, #tpu.memory_space<vmem>>, vector<80x192xf32>
    %c0_5 = arith.constant 0 : index
    %c0_6 = arith.constant 0 : index
    %5 = vector.load %arg6[%c0_5, %c0_6] : memref<1x192xf32, #tpu.memory_space<vmem>>, vector<1x192xf32>
    %c0_7 = arith.constant 0 : index
    %c0_8 = arith.constant 0 : index
    %6 = vector.load %arg8[%c0_7, %c0_8] : memref<2x32xf32, #tpu.memory_space<vmem>>, vector<2x32xf32>
    %c0_i32_9 = arith.constant 0 : i32
    %7 = arith.index_cast %c0_i32_9 : i32 to index
    %c0_10 = arith.constant 0 : index
    %c0_11 = arith.constant 0 : index
    %8 = vector.load %arg2[%7, %c0_10, %c0_11] : memref<8x2x16xf32, #tpu.memory_space<vmem>>, vector<1x2x16xf32>
    %9 = vector.shape_cast %8 : vector<1x2x16xf32> to vector<2x16xf32>
    %10 = vector.shape_cast %6 : vector<2x32xf32> to vector<2x1x32xf32>
    %11 = vector.broadcast %10 : vector<2x1x32xf32> to vector<2x8x32xf32>
    %12 = arith.mulf %11, %3 : vector<2x8x32xf32>
    %cst = arith.constant dense<0.000000e+00> : vector<2x8xf32>
    %13 = vector.multi_reduction <add>, %12, %cst [2] : vector<2x8x32xf32> to vector<2x8xf32>
    %cst_12 = arith.constant dense<0xFF800000> : vector<2xf32>
    %14 = vector.multi_reduction <maximumf>, %13, %cst_12 [1] : vector<2x8xf32> to vector<2xf32>
    %15 = vector.shape_cast %14 : vector<2xf32> to vector<2x1xf32>
    %16 = vector.broadcast %15 : vector<2x1xf32> to vector<2x8xf32>
    %17 = arith.subf %13, %16 : vector<2x8xf32>
    %18 = math.exp %17 : vector<2x8xf32>
    %cst_13 = arith.constant dense<0.000000e+00> : vector<2xf32>
    %19 = vector.multi_reduction <add>, %18, %cst_13 [1] : vector<2x8xf32> to vector<2xf32>
    %20 = vector.shape_cast %19 : vector<2xf32> to vector<2x1xf32>
    %21 = tpu.reciprocal %20 {approx = true} : vector<2x1xf32> -> vector<2x1xf32>
    %22 = vector.broadcast %21 : vector<2x1xf32> to vector<2x8xf32>
    %23 = arith.mulf %18, %22 : vector<2x8xf32>
    %24 = vector.shape_cast %23 : vector<2x8xf32> to vector<2x8x1xf32>
    %25 = vector.broadcast %24 : vector<2x8x1xf32> to vector<2x8x32xf32>
    %26 = arith.mulf %25, %3 : vector<2x8x32xf32>
    %cst_14 = arith.constant dense<0.000000e+00> : vector<2x32xf32>
    %27 = vector.multi_reduction <add>, %26, %cst_14 [1] : vector<2x8x32xf32> to vector<2x32xf32>
    %28 = tpu.concatenate %9, %27, %6 in 1 : vector<2x16xf32>, vector<2x32xf32>, vector<2x32xf32> -> vector<2x80xf32>
    %cst_15 = arith.constant dense<0.000000e+00> : vector<2x192xf32>
    %29 = tpu.matmul %28, %4, %cst_15 {dimension_numbers = #tpu.dot_dimension_numbers<[1], [0], [0], [1], [0, 0, 1, 1], [], []>} : vector<2x80xf32>, vector<80x192xf32>, vector<2x192xf32> -> vector<2x192xf32>
    %30 = vector.broadcast %5 : vector<1x192xf32> to vector<2x192xf32>
    %31 = arith.addf %29, %30 : vector<2x192xf32>
    %32 = vector.extract_strided_slice %31 {offsets = [0, 0], sizes = [2, 96], strides = [1, 1]} : vector<2x192xf32> to vector<2x96xf32>
    %33 = vector.extract_strided_slice %31 {offsets = [0, 96], sizes = [2, 96], strides = [1, 1]} : vector<2x192xf32> to vector<2x96xf32>
    %34 = vector.extract_strided_slice %32 {offsets = [0, 0], sizes = [2, 32], strides = [1, 1]} : vector<2x96xf32> to vector<2x32xf32>
    %35 = vector.extract_strided_slice %33 {offsets = [0, 0], sizes = [2, 32], strides = [1, 1]} : vector<2x96xf32> to vector<2x32xf32>
    %36 = arith.addf %34, %35 : vector<2x32xf32>
    %37 = arith.negf %36 : vector<2x32xf32>
    %38 = math.exp %37 : vector<2x32xf32>
    %cst_16 = arith.constant 1.000000e+00 : f32
    %39 = vector.broadcast %cst_16 : f32 to vector<2x32xf32>
    %40 = arith.addf %39, %38 : vector<2x32xf32>
    %41 = arith.divf %39, %40 : vector<2x32xf32>
    %42 = vector.extract_strided_slice %32 {offsets = [0, 32], sizes = [2, 32], strides = [1, 1]} : vector<2x96xf32> to vector<2x32xf32>
    %43 = vector.extract_strided_slice %33 {offsets = [0, 32], sizes = [2, 32], strides = [1, 1]} : vector<2x96xf32> to vector<2x32xf32>
    %44 = arith.addf %42, %43 : vector<2x32xf32>
    %45 = arith.negf %44 : vector<2x32xf32>
    %46 = math.exp %45 : vector<2x32xf32>
    %cst_17 = arith.constant 1.000000e+00 : f32
    %47 = vector.broadcast %cst_17 : f32 to vector<2x32xf32>
    %48 = arith.addf %47, %46 : vector<2x32xf32>
    %49 = arith.divf %47, %48 : vector<2x32xf32>
    %50 = vector.extract_strided_slice %32 {offsets = [0, 64], sizes = [2, 32], strides = [1, 1]} : vector<2x96xf32> to vector<2x32xf32>
    %51 = vector.extract_strided_slice %33 {offsets = [0, 64], sizes = [2, 32], strides = [1, 1]} : vector<2x96xf32> to vector<2x32xf32>
    %52 = arith.mulf %41, %51 : vector<2x32xf32>
    %53 = arith.addf %50, %52 : vector<2x32xf32>
    %54 = math.tanh %53 : vector<2x32xf32>
    %cst_18 = arith.constant 1.000000e+00 : f32
    %55 = vector.broadcast %cst_18 : f32 to vector<2x32xf32>
    %56 = arith.subf %55, %49 : vector<2x32xf32>
    %57 = arith.mulf %56, %54 : vector<2x32xf32>
    %58 = arith.mulf %49, %6 : vector<2x32xf32>
    %59 = arith.addf %57, %58 : vector<2x32xf32>
    %60 = tpu.concatenate %59, %27 in 1 : vector<2x32xf32>, vector<2x32xf32> -> vector<2x64xf32>
    %61 = arith.truncf %60 : vector<2x64xf32> to vector<2x64xbf16>
    %62 = arith.index_cast %c0_i32_9 : i32 to index
    %c0_19 = arith.constant 0 : index
    %c0_20 = arith.constant 0 : index
    %63 = vector.load %arg7[%62, %c0_19, %c0_20] : memref<8x2x64xbf16, #tpu.memory_space<vmem>>, vector<1x2x64xbf16>
    %64 = vector.shape_cast %63 : vector<1x2x64xbf16> to vector<2x64xbf16>
    %65 = vector.shape_cast %61 : vector<2x64xbf16> to vector<1x2x64xbf16>
    tpu.vector_store %arg7[%62, %c0_19, %c0_20], %65 {strides = array<i32>} : memref<8x2x64xbf16, #tpu.memory_space<vmem>>, vector<1x2x64xbf16>,
    %c1_i32 = arith.constant 1 : i32
    %66 = arith.index_cast %c1_i32 : i32 to index
    %c0_21 = arith.constant 0 : index
    %c0_22 = arith.constant 0 : index
    %67 = vector.load %arg2[%66, %c0_21, %c0_22] : memref<8x2x16xf32, #tpu.memory_space<vmem>>, vector<1x2x16xf32>
    %68 = vector.shape_cast %67 : vector<1x2x16xf32> to vector<2x16xf32>
    %69 = vector.shape_cast %59 : vector<2x32xf32> to vector<2x1x32xf32>
    %70 = vector.broadcast %69 : vector<2x1x32xf32> to vector<2x8x32xf32>
    %71 = arith.mulf %70, %3 : vector<2x8x32xf32>
    %cst_23 = arith.constant dense<0.000000e+00> : vector<2x8xf32>
    %72 = vector.multi_reduction <add>, %71, %cst_23 [2] : vector<2x8x32xf32> to vector<2x8xf32>
    %cst_24 = arith.constant dense<0xFF800000> : vector<2xf32>
    %73 = vector.multi_reduction <maximumf>, %72, %cst_24 [1] : vector<2x8xf32> to vector<2xf32>
    %74 = vector.shape_cast %73 : vector<2xf32> to vector<2x1xf32>
    %75 = vector.broadcast %74 : vector<2x1xf32> to vector<2x8xf32>
    %76 = arith.subf %72, %75 : vector<2x8xf32>
    %77 = math.exp %76 : vector<2x8xf32>
    %cst_25 = arith.constant dense<0.000000e+00> : vector<2xf32>
    %78 = vector.multi_reduction <add>, %77, %cst_25 [1] : vector<2x8xf32> to vector<2xf32>
    %79 = vector.shape_cast %78 : vector<2xf32> to vector<2x1xf32>
    %80 = tpu.reciprocal %79 {approx = true} : vector<2x1xf32> -> vector<2x1xf32>
    %81 = vector.broadcast %80 : vector<2x1xf32> to vector<2x8xf32>
    %82 = arith.mulf %77, %81 : vector<2x8xf32>
    %83 = vector.shape_cast %82 : vector<2x8xf32> to vector<2x8x1xf32>
    %84 = vector.broadcast %83 : vector<2x8x1xf32> to vector<2x8x32xf32>
    %85 = arith.mulf %84, %3 : vector<2x8x32xf32>
    %cst_26 = arith.constant dense<0.000000e+00> : vector<2x32xf32>
    %86 = vector.multi_reduction <add>, %85, %cst_26 [1] : vector<2x8x32xf32> to vector<2x32xf32>
    %87 = tpu.concatenate %68, %86, %59 in 1 : vector<2x16xf32>, vector<2x32xf32>, vector<2x32xf32> -> vector<2x80xf32>
    %cst_27 = arith.constant dense<0.000000e+00> : vector<2x192xf32>
    %88 = tpu.matmul %87, %4, %cst_27 {dimension_numbers = #tpu.dot_dimension_numbers<[1], [0], [0], [1], [0, 0, 1, 1], [], []>} : vector<2x80xf32>, vector<80x192xf32>, vector<2x192xf32> -> vector<2x192xf32>
    %89 = vector.broadcast %5 : vector<1x192xf32> to vector<2x192xf32>
    %90 = arith.addf %88, %89 : vector<2x192xf32>
    %91 = vector.extract_strided_slice %90 {offsets = [0, 0], sizes = [2, 96], strides = [1, 1]} : vector<2x192xf32> to vector<2x96xf32>
    %92 = vector.extract_strided_slice %90 {offsets = [0, 96], sizes = [2, 96], strides = [1, 1]} : vector<2x192xf32> to vector<2x96xf32>
    %93 = vector.extract_strided_slice %91 {offsets = [0, 0], sizes = [2, 32], strides = [1, 1]} : vector<2x96xf32> to vector<2x32xf32>
    %94 = vector.extract_strided_slice %92 {offsets = [0, 0], sizes = [2, 32], strides = [1, 1]} : vector<2x96xf32> to vector<2x32xf32>
    %95 = arith.addf %93, %94 : vector<2x32xf32>
    %96 = arith.negf %95 : vector<2x32xf32>
    %97 = math.exp %96 : vector<2x32xf32>
    %cst_28 = arith.constant 1.000000e+00 : f32
    %98 = vector.broadcast %cst_28 : f32 to vector<2x32xf32>
    %99 = arith.addf %98, %97 : vector<2x32xf32>
    %100 = arith.divf %98, %99 : vector<2x32xf32>
    %101 = vector.extract_strided_slice %91 {offsets = [0, 32], sizes = [2, 32], strides = [1, 1]} : vector<2x96xf32> to vector<2x32xf32>
    %102 = vector.extract_strided_slice %92 {offsets = [0, 32], sizes = [2, 32], strides = [1, 1]} : vector<2x96xf32> to vector<2x32xf32>
    %103 = arith.addf %101, %102 : vector<2x32xf32>
    %104 = arith.negf %103 : vector<2x32xf32>
    %105 = math.exp %104 : vector<2x32xf32>
    %cst_29 = arith.constant 1.000000e+00 : f32
    %106 = vector.broadcast %cst_29 : f32 to vector<2x32xf32>
    %107 = arith.addf %106, %105 : vector<2x32xf32>
    %108 = arith.divf %106, %107 : vector<2x32xf32>
    %109 = vector.extract_strided_slice %91 {offsets = [0, 64], sizes = [2, 32], strides = [1, 1]} : vector<2x96xf32> to vector<2x32xf32>
    %110 = vector.extract_strided_slice %92 {offsets = [0, 64], sizes = [2, 32], strides = [1, 1]} : vector<2x96xf32> to vector<2x32xf32>
    %111 = arith.mulf %100, %110 : vector<2x32xf32>
    %112 = arith.addf %109, %111 : vector<2x32xf32>
    %113 = math.tanh %112 : vector<2x32xf32>
    %cst_30 = arith.constant 1.000000e+00 : f32
    %114 = vector.broadcast %cst_30 : f32 to vector<2x32xf32>
    %115 = arith.subf %114, %108 : vector<2x32xf32>
    %116 = arith.mulf %115, %113 : vector<2x32xf32>
    %117 = arith.mulf %108, %59 : vector<2x32xf32>
    %118 = arith.addf %116, %117 : vector<2x32xf32>
    %119 = tpu.concatenate %118, %86 in 1 : vector<2x32xf32>, vector<2x32xf32> -> vector<2x64xf32>
    %120 = arith.truncf %119 : vector<2x64xf32> to vector<2x64xbf16>
    %121 = arith.index_cast %c1_i32 : i32 to index
    %c0_31 = arith.constant 0 : index
    %c0_32 = arith.constant 0 : index
    %122 = vector.load %arg7[%121, %c0_31, %c0_32] : memref<8x2x64xbf16, #tpu.memory_space<vmem>>, vector<1x2x64xbf16>
    %123 = vector.shape_cast %122 : vector<1x2x64xbf16> to vector<2x64xbf16>
    %124 = vector.shape_cast %120 : vector<2x64xbf16> to vector<1x2x64xbf16>
    tpu.vector_store %arg7[%121, %c0_31, %c0_32], %124 {strides = array<i32>} : memref<8x2x64xbf16, #tpu.memory_space<vmem>>, vector<1x2x64xbf16>,
    %c2_i32 = arith.constant 2 : i32
    %125 = arith.index_cast %c2_i32 : i32 to index
    %c0_33 = arith.constant 0 : index
    %c0_34 = arith.constant 0 : index
    %126 = vector.load %arg2[%125, %c0_33, %c0_34] : memref<8x2x16xf32, #tpu.memory_space<vmem>>, vector<1x2x16xf32>
    %127 = vector.shape_cast %126 : vector<1x2x16xf32> to vector<2x16xf32>
    %128 = vector.shape_cast %118 : vector<2x32xf32> to vector<2x1x32xf32>
    %129 = vector.broadcast %128 : vector<2x1x32xf32> to vector<2x8x32xf32>
    %130 = arith.mulf %129, %3 : vector<2x8x32xf32>
    %cst_35 = arith.constant dense<0.000000e+00> : vector<2x8xf32>
    %131 = vector.multi_reduction <add>, %130, %cst_35 [2] : vector<2x8x32xf32> to vector<2x8xf32>
    %cst_36 = arith.constant dense<0xFF800000> : vector<2xf32>
    %132 = vector.multi_reduction <maximumf>, %131, %cst_36 [1] : vector<2x8xf32> to vector<2xf32>
    %133 = vector.shape_cast %132 : vector<2xf32> to vector<2x1xf32>
    %134 = vector.broadcast %133 : vector<2x1xf32> to vector<2x8xf32>
    %135 = arith.subf %131, %134 : vector<2x8xf32>
    %136 = math.exp %135 : vector<2x8xf32>
    %cst_37 = arith.constant dense<0.000000e+00> : vector<2xf32>
    %137 = vector.multi_reduction <add>, %136, %cst_37 [1] : vector<2x8xf32> to vector<2xf32>
    %138 = vector.shape_cast %137 : vector<2xf32> to vector<2x1xf32>
    %139 = tpu.reciprocal %138 {approx = true} : vector<2x1xf32> -> vector<2x1xf32>
    %140 = vector.broadcast %139 : vector<2x1xf32> to vector<2x8xf32>
    %141 = arith.mulf %136, %140 : vector<2x8xf32>
    %142 = vector.shape_cast %141 : vector<2x8xf32> to vector<2x8x1xf32>
    %143 = vector.broadcast %142 : vector<2x8x1xf32> to vector<2x8x32xf32>
    %144 = arith.mulf %143, %3 : vector<2x8x32xf32>
    %cst_38 = arith.constant dense<0.000000e+00> : vector<2x32xf32>
    %145 = vector.multi_reduction <add>, %144, %cst_38 [1] : vector<2x8x32xf32> to vector<2x32xf32>
    %146 = tpu.concatenate %127, %145, %118 in 1 : vector<2x16xf32>, vector<2x32xf32>, vector<2x32xf32> -> vector<2x80xf32>
    %cst_39 = arith.constant dense<0.000000e+00> : vector<2x192xf32>
    %147 = tpu.matmul %146, %4, %cst_39 {dimension_numbers = #tpu.dot_dimension_numbers<[1], [0], [0], [1], [0, 0, 1, 1], [], []>} : vector<2x80xf32>, vector<80x192xf32>, vector<2x192xf32> -> vector<2x192xf32>
    %148 = vector.broadcast %5 : vector<1x192xf32> to vector<2x192xf32>
    %149 = arith.addf %147, %148 : vector<2x192xf32>
    %150 = vector.extract_strided_slice %149 {offsets = [0, 0], sizes = [2, 96], strides = [1, 1]} : vector<2x192xf32> to vector<2x96xf32>
    %151 = vector.extract_strided_slice %149 {offsets = [0, 96], sizes = [2, 96], strides = [1, 1]} : vector<2x192xf32> to vector<2x96xf32>
    %152 = vector.extract_strided_slice %150 {offsets = [0, 0], sizes = [2, 32], strides = [1, 1]} : vector<2x96xf32> to vector<2x32xf32>
    %153 = vector.extract_strided_slice %151 {offsets = [0, 0], sizes = [2, 32], strides = [1, 1]} : vector<2x96xf32> to vector<2x32xf32>
    %154 = arith.addf %152, %153 : vector<2x32xf32>
    %155 = arith.negf %154 : vector<2x32xf32>
    %156 = math.exp %155 : vector<2x32xf32>
    %cst_40 = arith.constant 1.000000e+00 : f32
    %157 = vector.broadcast %cst_40 : f32 to vector<2x32xf32>
    %158 = arith.addf %157, %156 : vector<2x32xf32>
    %159 = arith.divf %157, %158 : vector<2x32xf32>
    %160 = vector.extract_strided_slice %150 {offsets = [0, 32], sizes = [2, 32], strides = [1, 1]} : vector<2x96xf32> to vector<2x32xf32>
    %161 = vector.extract_strided_slice %151 {offsets = [0, 32], sizes = [2, 32], strides = [1, 1]} : vector<2x96xf32> to vector<2x32xf32>
    %162 = arith.addf %160, %161 : vector<2x32xf32>
    %163 = arith.negf %162 : vector<2x32xf32>
    %164 = math.exp %163 : vector<2x32xf32>
    %cst_41 = arith.constant 1.000000e+00 : f32
    %165 = vector.broadcast %cst_41 : f32 to vector<2x32xf32>
    %166 = arith.addf %165, %164 : vector<2x32xf32>
    %167 = arith.divf %165, %166 : vector<2x32xf32>
    %168 = vector.extract_strided_slice %150 {offsets = [0, 64], sizes = [2, 32], strides = [1, 1]} : vector<2x96xf32> to vector<2x32xf32>
    %169 = vector.extract_strided_slice %151 {offsets = [0, 64], sizes = [2, 32], strides = [1, 1]} : vector<2x96xf32> to vector<2x32xf32>
    %170 = arith.mulf %159, %169 : vector<2x32xf32>
    %171 = arith.addf %168, %170 : vector<2x32xf32>
    %172 = math.tanh %171 : vector<2x32xf32>
    %cst_42 = arith.constant 1.000000e+00 : f32
    %173 = vector.broadcast %cst_42 : f32 to vector<2x32xf32>
    %174 = arith.subf %173, %167 : vector<2x32xf32>
    %175 = arith.mulf %174, %172 : vector<2x32xf32>
    %176 = arith.mulf %167, %118 : vector<2x32xf32>
    %177 = arith.addf %175, %176 : vector<2x32xf32>
    %178 = tpu.concatenate %177, %145 in 1 : vector<2x32xf32>, vector<2x32xf32> -> vector<2x64xf32>
    %179 = arith.truncf %178 : vector<2x64xf32> to vector<2x64xbf16>
    %180 = arith.index_cast %c2_i32 : i32 to index
    %c0_43 = arith.constant 0 : index
    %c0_44 = arith.constant 0 : index
    %181 = vector.load %arg7[%180, %c0_43, %c0_44] : memref<8x2x64xbf16, #tpu.memory_space<vmem>>, vector<1x2x64xbf16>
    %182 = vector.shape_cast %181 : vector<1x2x64xbf16> to vector<2x64xbf16>
    %183 = vector.shape_cast %179 : vector<2x64xbf16> to vector<1x2x64xbf16>
    tpu.vector_store %arg7[%180, %c0_43, %c0_44], %183 {strides = array<i32>} : memref<8x2x64xbf16, #tpu.memory_space<vmem>>, vector<1x2x64xbf16>,
    %c3_i32 = arith.constant 3 : i32
    %184 = arith.index_cast %c3_i32 : i32 to index
    %c0_45 = arith.constant 0 : index
    %c0_46 = arith.constant 0 : index
    %185 = vector.load %arg2[%184, %c0_45, %c0_46] : memref<8x2x16xf32, #tpu.memory_space<vmem>>, vector<1x2x16xf32>
    %186 = vector.shape_cast %185 : vector<1x2x16xf32> to vector<2x16xf32>
    %187 = vector.shape_cast %177 : vector<2x32xf32> to vector<2x1x32xf32>
    %188 = vector.broadcast %187 : vector<2x1x32xf32> to vector<2x8x32xf32>
    %189 = arith.mulf %188, %3 : vector<2x8x32xf32>
    %cst_47 = arith.constant dense<0.000000e+00> : vector<2x8xf32>
    %190 = vector.multi_reduction <add>, %189, %cst_47 [2] : vector<2x8x32xf32> to vector<2x8xf32>
    %cst_48 = arith.constant dense<0xFF800000> : vector<2xf32>
    %191 = vector.multi_reduction <maximumf>, %190, %cst_48 [1] : vector<2x8xf32> to vector<2xf32>
    %192 = vector.shape_cast %191 : vector<2xf32> to vector<2x1xf32>
    %193 = vector.broadcast %192 : vector<2x1xf32> to vector<2x8xf32>
    %194 = arith.subf %190, %193 : vector<2x8xf32>
    %195 = math.exp %194 : vector<2x8xf32>
    %cst_49 = arith.constant dense<0.000000e+00> : vector<2xf32>
    %196 = vector.multi_reduction <add>, %195, %cst_49 [1] : vector<2x8xf32> to vector<2xf32>
    %197 = vector.shape_cast %196 : vector<2xf32> to vector<2x1xf32>
    %198 = tpu.reciprocal %197 {approx = true} : vector<2x1xf32> -> vector<2x1xf32>
    %199 = vector.broadcast %198 : vector<2x1xf32> to vector<2x8xf32>
    %200 = arith.mulf %195, %199 : vector<2x8xf32>
    %201 = vector.shape_cast %200 : vector<2x8xf32> to vector<2x8x1xf32>
    %202 = vector.broadcast %201 : vector<2x8x1xf32> to vector<2x8x32xf32>
    %203 = arith.mulf %202, %3 : vector<2x8x32xf32>
    %cst_50 = arith.constant dense<0.000000e+00> : vector<2x32xf32>
    %204 = vector.multi_reduction <add>, %203, %cst_50 [1] : vector<2x8x32xf32> to vector<2x32xf32>
    %205 = tpu.concatenate %186, %204, %177 in 1 : vector<2x16xf32>, vector<2x32xf32>, vector<2x32xf32> -> vector<2x80xf32>
    %cst_51 = arith.constant dense<0.000000e+00> : vector<2x192xf32>
    %206 = tpu.matmul %205, %4, %cst_51 {dimension_numbers = #tpu.dot_dimension_numbers<[1], [0], [0], [1], [0, 0, 1, 1], [], []>} : vector<2x80xf32>, vector<80x192xf32>, vector<2x192xf32> -> vector<2x192xf32>
    %207 = vector.broadcast %5 : vector<1x192xf32> to vector<2x192xf32>
    %208 = arith.addf %206, %207 : vector<2x192xf32>
    %209 = vector.extract_strided_slice %208 {offsets = [0, 0], sizes = [2, 96], strides = [1, 1]} : vector<2x192xf32> to vector<2x96xf32>
    %210 = vector.extract_strided_slice %208 {offsets = [0, 96], sizes = [2, 96], strides = [1, 1]} : vector<2x192xf32> to vector<2x96xf32>
    %211 = vector.extract_strided_slice %209 {offsets = [0, 0], sizes = [2, 32], strides = [1, 1]} : vector<2x96xf32> to vector<2x32xf32>
    %212 = vector.extract_strided_slice %210 {offsets = [0, 0], sizes = [2, 32], strides = [1, 1]} : vector<2x96xf32> to vector<2x32xf32>
    %213 = arith.addf %211, %212 : vector<2x32xf32>
    %214 = arith.negf %213 : vector<2x32xf32>
    %215 = math.exp %214 : vector<2x32xf32>
    %cst_52 = arith.constant 1.000000e+00 : f32
    %216 = vector.broadcast %cst_52 : f32 to vector<2x32xf32>
    %217 = arith.addf %216, %215 : vector<2x32xf32>
    %218 = arith.divf %216, %217 : vector<2x32xf32>
    %219 = vector.extract_strided_slice %209 {offsets = [0, 32], sizes = [2, 32], strides = [1, 1]} : vector<2x96xf32> to vector<2x32xf32>
    %220 = vector.extract_strided_slice %210 {offsets = [0, 32], sizes = [2, 32], strides = [1, 1]} : vector<2x96xf32> to vector<2x32xf32>
    %221 = arith.addf %219, %220 : vector<2x32xf32>
    %222 = arith.negf %221 : vector<2x32xf32>
    %223 = math.exp %222 : vector<2x32xf32>
    %cst_53 = arith.constant 1.000000e+00 : f32
    %224 = vector.broadcast %cst_53 : f32 to vector<2x32xf32>
    %225 = arith.addf %224, %223 : vector<2x32xf32>
    %226 = arith.divf %224, %225 : vector<2x32xf32>
    %227 = vector.extract_strided_slice %209 {offsets = [0, 64], sizes = [2, 32], strides = [1, 1]} : vector<2x96xf32> to vector<2x32xf32>
    %228 = vector.extract_strided_slice %210 {offsets = [0, 64], sizes = [2, 32], strides = [1, 1]} : vector<2x96xf32> to vector<2x32xf32>
    %229 = arith.mulf %218, %228 : vector<2x32xf32>
    %230 = arith.addf %227, %229 : vector<2x32xf32>
    %231 = math.tanh %230 : vector<2x32xf32>
    %cst_54 = arith.constant 1.000000e+00 : f32
    %232 = vector.broadcast %cst_54 : f32 to vector<2x32xf32>
    %233 = arith.subf %232, %226 : vector<2x32xf32>
    %234 = arith.mulf %233, %231 : vector<2x32xf32>
    %235 = arith.mulf %226, %177 : vector<2x32xf32>
    %236 = arith.addf %234, %235 : vector<2x32xf32>
    %237 = tpu.concatenate %236, %204 in 1 : vector<2x32xf32>, vector<2x32xf32> -> vector<2x64xf32>
    %238 = arith.truncf %237 : vector<2x64xf32> to vector<2x64xbf16>
    %239 = arith.index_cast %c3_i32 : i32 to index
    %c0_55 = arith.constant 0 : index
    %c0_56 = arith.constant 0 : index
    %240 = vector.load %arg7[%239, %c0_55, %c0_56] : memref<8x2x64xbf16, #tpu.memory_space<vmem>>, vector<1x2x64xbf16>
    %241 = vector.shape_cast %240 : vector<1x2x64xbf16> to vector<2x64xbf16>
    %242 = vector.shape_cast %238 : vector<2x64xbf16> to vector<1x2x64xbf16>
    tpu.vector_store %arg7[%239, %c0_55, %c0_56], %242 {strides = array<i32>} : memref<8x2x64xbf16, #tpu.memory_space<vmem>>, vector<1x2x64xbf16>,
    %c4_i32 = arith.constant 4 : i32
    %243 = arith.index_cast %c4_i32 : i32 to index
    %c0_57 = arith.constant 0 : index
    %c0_58 = arith.constant 0 : index
    %244 = vector.load %arg2[%243, %c0_57, %c0_58] : memref<8x2x16xf32, #tpu.memory_space<vmem>>, vector<1x2x16xf32>
    %245 = vector.shape_cast %244 : vector<1x2x16xf32> to vector<2x16xf32>
    %246 = vector.shape_cast %236 : vector<2x32xf32> to vector<2x1x32xf32>
    %247 = vector.broadcast %246 : vector<2x1x32xf32> to vector<2x8x32xf32>
    %248 = arith.mulf %247, %3 : vector<2x8x32xf32>
    %cst_59 = arith.constant dense<0.000000e+00> : vector<2x8xf32>
    %249 = vector.multi_reduction <add>, %248, %cst_59 [2] : vector<2x8x32xf32> to vector<2x8xf32>
    %cst_60 = arith.constant dense<0xFF800000> : vector<2xf32>
    %250 = vector.multi_reduction <maximumf>, %249, %cst_60 [1] : vector<2x8xf32> to vector<2xf32>
    %251 = vector.shape_cast %250 : vector<2xf32> to vector<2x1xf32>
    %252 = vector.broadcast %251 : vector<2x1xf32> to vector<2x8xf32>
    %253 = arith.subf %249, %252 : vector<2x8xf32>
    %254 = math.exp %253 : vector<2x8xf32>
    %cst_61 = arith.constant dense<0.000000e+00> : vector<2xf32>
    %255 = vector.multi_reduction <add>, %254, %cst_61 [1] : vector<2x8xf32> to vector<2xf32>
    %256 = vector.shape_cast %255 : vector<2xf32> to vector<2x1xf32>
    %257 = tpu.reciprocal %256 {approx = true} : vector<2x1xf32> -> vector<2x1xf32>
    %258 = vector.broadcast %257 : vector<2x1xf32> to vector<2x8xf32>
    %259 = arith.mulf %254, %258 : vector<2x8xf32>
    %260 = vector.shape_cast %259 : vector<2x8xf32> to vector<2x8x1xf32>
    %261 = vector.broadcast %260 : vector<2x8x1xf32> to vector<2x8x32xf32>
    %262 = arith.mulf %261, %3 : vector<2x8x32xf32>
    %cst_62 = arith.constant dense<0.000000e+00> : vector<2x32xf32>
    %263 = vector.multi_reduction <add>, %262, %cst_62 [1] : vector<2x8x32xf32> to vector<2x32xf32>
    %264 = tpu.concatenate %245, %263, %236 in 1 : vector<2x16xf32>, vector<2x32xf32>, vector<2x32xf32> -> vector<2x80xf32>
    %cst_63 = arith.constant dense<0.000000e+00> : vector<2x192xf32>
    %265 = tpu.matmul %264, %4, %cst_63 {dimension_numbers = #tpu.dot_dimension_numbers<[1], [0], [0], [1], [0, 0, 1, 1], [], []>} : vector<2x80xf32>, vector<80x192xf32>, vector<2x192xf32> -> vector<2x192xf32>
    %266 = vector.broadcast %5 : vector<1x192xf32> to vector<2x192xf32>
    %267 = arith.addf %265, %266 : vector<2x192xf32>
    %268 = vector.extract_strided_slice %267 {offsets = [0, 0], sizes = [2, 96], strides = [1, 1]} : vector<2x192xf32> to vector<2x96xf32>
    %269 = vector.extract_strided_slice %267 {offsets = [0, 96], sizes = [2, 96], strides = [1, 1]} : vector<2x192xf32> to vector<2x96xf32>
    %270 = vector.extract_strided_slice %268 {offsets = [0, 0], sizes = [2, 32], strides = [1, 1]} : vector<2x96xf32> to vector<2x32xf32>
    %271 = vector.extract_strided_slice %269 {offsets = [0, 0], sizes = [2, 32], strides = [1, 1]} : vector<2x96xf32> to vector<2x32xf32>
    %272 = arith.addf %270, %271 : vector<2x32xf32>
    %273 = arith.negf %272 : vector<2x32xf32>
    %274 = math.exp %273 : vector<2x32xf32>
    %cst_64 = arith.constant 1.000000e+00 : f32
    %275 = vector.broadcast %cst_64 : f32 to vector<2x32xf32>
    %276 = arith.addf %275, %274 : vector<2x32xf32>
    %277 = arith.divf %275, %276 : vector<2x32xf32>
    %278 = vector.extract_strided_slice %268 {offsets = [0, 32], sizes = [2, 32], strides = [1, 1]} : vector<2x96xf32> to vector<2x32xf32>
    %279 = vector.extract_strided_slice %269 {offsets = [0, 32], sizes = [2, 32], strides = [1, 1]} : vector<2x96xf32> to vector<2x32xf32>
    %280 = arith.addf %278, %279 : vector<2x32xf32>
    %281 = arith.negf %280 : vector<2x32xf32>
    %282 = math.exp %281 : vector<2x32xf32>
    %cst_65 = arith.constant 1.000000e+00 : f32
    %283 = vector.broadcast %cst_65 : f32 to vector<2x32xf32>
    %284 = arith.addf %283, %282 : vector<2x32xf32>
    %285 = arith.divf %283, %284 : vector<2x32xf32>
    %286 = vector.extract_strided_slice %268 {offsets = [0, 64], sizes = [2, 32], strides = [1, 1]} : vector<2x96xf32> to vector<2x32xf32>
    %287 = vector.extract_strided_slice %269 {offsets = [0, 64], sizes = [2, 32], strides = [1, 1]} : vector<2x96xf32> to vector<2x32xf32>
    %288 = arith.mulf %277, %287 : vector<2x32xf32>
    %289 = arith.addf %286, %288 : vector<2x32xf32>
    %290 = math.tanh %289 : vector<2x32xf32>
    %cst_66 = arith.constant 1.000000e+00 : f32
    %291 = vector.broadcast %cst_66 : f32 to vector<2x32xf32>
    %292 = arith.subf %291, %285 : vector<2x32xf32>
    %293 = arith.mulf %292, %290 : vector<2x32xf32>
    %294 = arith.mulf %285, %236 : vector<2x32xf32>
    %295 = arith.addf %293, %294 : vector<2x32xf32>
    %296 = tpu.concatenate %295, %263 in 1 : vector<2x32xf32>, vector<2x32xf32> -> vector<2x64xf32>
    %297 = arith.truncf %296 : vector<2x64xf32> to vector<2x64xbf16>
    %298 = arith.index_cast %c4_i32 : i32 to index
    %c0_67 = arith.constant 0 : index
    %c0_68 = arith.constant 0 : index
    %299 = vector.load %arg7[%298, %c0_67, %c0_68] : memref<8x2x64xbf16, #tpu.memory_space<vmem>>, vector<1x2x64xbf16>
    %300 = vector.shape_cast %299 : vector<1x2x64xbf16> to vector<2x64xbf16>
    %301 = vector.shape_cast %297 : vector<2x64xbf16> to vector<1x2x64xbf16>
    tpu.vector_store %arg7[%298, %c0_67, %c0_68], %301 {strides = array<i32>} : memref<8x2x64xbf16, #tpu.memory_space<vmem>>, vector<1x2x64xbf16>,
    %c5_i32 = arith.constant 5 : i32
    %302 = arith.index_cast %c5_i32 : i32 to index
    %c0_69 = arith.constant 0 : index
    %c0_70 = arith.constant 0 : index
    %303 = vector.load %arg2[%302, %c0_69, %c0_70] : memref<8x2x16xf32, #tpu.memory_space<vmem>>, vector<1x2x16xf32>
    %304 = vector.shape_cast %303 : vector<1x2x16xf32> to vector<2x16xf32>
    %305 = vector.shape_cast %295 : vector<2x32xf32> to vector<2x1x32xf32>
    %306 = vector.broadcast %305 : vector<2x1x32xf32> to vector<2x8x32xf32>
    %307 = arith.mulf %306, %3 : vector<2x8x32xf32>
    %cst_71 = arith.constant dense<0.000000e+00> : vector<2x8xf32>
    %308 = vector.multi_reduction <add>, %307, %cst_71 [2] : vector<2x8x32xf32> to vector<2x8xf32>
    %cst_72 = arith.constant dense<0xFF800000> : vector<2xf32>
    %309 = vector.multi_reduction <maximumf>, %308, %cst_72 [1] : vector<2x8xf32> to vector<2xf32>
    %310 = vector.shape_cast %309 : vector<2xf32> to vector<2x1xf32>
    %311 = vector.broadcast %310 : vector<2x1xf32> to vector<2x8xf32>
    %312 = arith.subf %308, %311 : vector<2x8xf32>
    %313 = math.exp %312 : vector<2x8xf32>
    %cst_73 = arith.constant dense<0.000000e+00> : vector<2xf32>
    %314 = vector.multi_reduction <add>, %313, %cst_73 [1] : vector<2x8xf32> to vector<2xf32>
    %315 = vector.shape_cast %314 : vector<2xf32> to vector<2x1xf32>
    %316 = tpu.reciprocal %315 {approx = true} : vector<2x1xf32> -> vector<2x1xf32>
    %317 = vector.broadcast %316 : vector<2x1xf32> to vector<2x8xf32>
    %318 = arith.mulf %313, %317 : vector<2x8xf32>
    %319 = vector.shape_cast %318 : vector<2x8xf32> to vector<2x8x1xf32>
    %320 = vector.broadcast %319 : vector<2x8x1xf32> to vector<2x8x32xf32>
    %321 = arith.mulf %320, %3 : vector<2x8x32xf32>
    %cst_74 = arith.constant dense<0.000000e+00> : vector<2x32xf32>
    %322 = vector.multi_reduction <add>, %321, %cst_74 [1] : vector<2x8x32xf32> to vector<2x32xf32>
    %323 = tpu.concatenate %304, %322, %295 in 1 : vector<2x16xf32>, vector<2x32xf32>, vector<2x32xf32> -> vector<2x80xf32>
    %cst_75 = arith.constant dense<0.000000e+00> : vector<2x192xf32>
    %324 = tpu.matmul %323, %4, %cst_75 {dimension_numbers = #tpu.dot_dimension_numbers<[1], [0], [0], [1], [0, 0, 1, 1], [], []>} : vector<2x80xf32>, vector<80x192xf32>, vector<2x192xf32> -> vector<2x192xf32>
    %325 = vector.broadcast %5 : vector<1x192xf32> to vector<2x192xf32>
    %326 = arith.addf %324, %325 : vector<2x192xf32>
    %327 = vector.extract_strided_slice %326 {offsets = [0, 0], sizes = [2, 96], strides = [1, 1]} : vector<2x192xf32> to vector<2x96xf32>
    %328 = vector.extract_strided_slice %326 {offsets = [0, 96], sizes = [2, 96], strides = [1, 1]} : vector<2x192xf32> to vector<2x96xf32>
    %329 = vector.extract_strided_slice %327 {offsets = [0, 0], sizes = [2, 32], strides = [1, 1]} : vector<2x96xf32> to vector<2x32xf32>
    %330 = vector.extract_strided_slice %328 {offsets = [0, 0], sizes = [2, 32], strides = [1, 1]} : vector<2x96xf32> to vector<2x32xf32>
    %331 = arith.addf %329, %330 : vector<2x32xf32>
    %332 = arith.negf %331 : vector<2x32xf32>
    %333 = math.exp %332 : vector<2x32xf32>
    %cst_76 = arith.constant 1.000000e+00 : f32
    %334 = vector.broadcast %cst_76 : f32 to vector<2x32xf32>
    %335 = arith.addf %334, %333 : vector<2x32xf32>
    %336 = arith.divf %334, %335 : vector<2x32xf32>
    %337 = vector.extract_strided_slice %327 {offsets = [0, 32], sizes = [2, 32], strides = [1, 1]} : vector<2x96xf32> to vector<2x32xf32>
    %338 = vector.extract_strided_slice %328 {offsets = [0, 32], sizes = [2, 32], strides = [1, 1]} : vector<2x96xf32> to vector<2x32xf32>
    %339 = arith.addf %337, %338 : vector<2x32xf32>
    %340 = arith.negf %339 : vector<2x32xf32>
    %341 = math.exp %340 : vector<2x32xf32>
    %cst_77 = arith.constant 1.000000e+00 : f32
    %342 = vector.broadcast %cst_77 : f32 to vector<2x32xf32>
    %343 = arith.addf %342, %341 : vector<2x32xf32>
    %344 = arith.divf %342, %343 : vector<2x32xf32>
    %345 = vector.extract_strided_slice %327 {offsets = [0, 64], sizes = [2, 32], strides = [1, 1]} : vector<2x96xf32> to vector<2x32xf32>
    %346 = vector.extract_strided_slice %328 {offsets = [0, 64], sizes = [2, 32], strides = [1, 1]} : vector<2x96xf32> to vector<2x32xf32>
    %347 = arith.mulf %336, %346 : vector<2x32xf32>
    %348 = arith.addf %345, %347 : vector<2x32xf32>
    %349 = math.tanh %348 : vector<2x32xf32>
    %cst_78 = arith.constant 1.000000e+00 : f32
    %350 = vector.broadcast %cst_78 : f32 to vector<2x32xf32>
    %351 = arith.subf %350, %344 : vector<2x32xf32>
    %352 = arith.mulf %351, %349 : vector<2x32xf32>
    %353 = arith.mulf %344, %295 : vector<2x32xf32>
    %354 = arith.addf %352, %353 : vector<2x32xf32>
    %355 = tpu.concatenate %354, %322 in 1 : vector<2x32xf32>, vector<2x32xf32> -> vector<2x64xf32>
    %356 = arith.truncf %355 : vector<2x64xf32> to vector<2x64xbf16>
    %357 = arith.index_cast %c5_i32 : i32 to index
    %c0_79 = arith.constant 0 : index
    %c0_80 = arith.constant 0 : index
    %358 = vector.load %arg7[%357, %c0_79, %c0_80] : memref<8x2x64xbf16, #tpu.memory_space<vmem>>, vector<1x2x64xbf16>
    %359 = vector.shape_cast %358 : vector<1x2x64xbf16> to vector<2x64xbf16>
    %360 = vector.shape_cast %356 : vector<2x64xbf16> to vector<1x2x64xbf16>
    tpu.vector_store %arg7[%357, %c0_79, %c0_80], %360 {strides = array<i32>} : memref<8x2x64xbf16, #tpu.memory_space<vmem>>, vector<1x2x64xbf16>,
    %c6_i32 = arith.constant 6 : i32
    %361 = arith.index_cast %c6_i32 : i32 to index
    %c0_81 = arith.constant 0 : index
    %c0_82 = arith.constant 0 : index
    %362 = vector.load %arg2[%361, %c0_81, %c0_82] : memref<8x2x16xf32, #tpu.memory_space<vmem>>, vector<1x2x16xf32>
    %363 = vector.shape_cast %362 : vector<1x2x16xf32> to vector<2x16xf32>
    %364 = vector.shape_cast %354 : vector<2x32xf32> to vector<2x1x32xf32>
    %365 = vector.broadcast %364 : vector<2x1x32xf32> to vector<2x8x32xf32>
    %366 = arith.mulf %365, %3 : vector<2x8x32xf32>
    %cst_83 = arith.constant dense<0.000000e+00> : vector<2x8xf32>
    %367 = vector.multi_reduction <add>, %366, %cst_83 [2] : vector<2x8x32xf32> to vector<2x8xf32>
    %cst_84 = arith.constant dense<0xFF800000> : vector<2xf32>
    %368 = vector.multi_reduction <maximumf>, %367, %cst_84 [1] : vector<2x8xf32> to vector<2xf32>
    %369 = vector.shape_cast %368 : vector<2xf32> to vector<2x1xf32>
    %370 = vector.broadcast %369 : vector<2x1xf32> to vector<2x8xf32>
    %371 = arith.subf %367, %370 : vector<2x8xf32>
    %372 = math.exp %371 : vector<2x8xf32>
    %cst_85 = arith.constant dense<0.000000e+00> : vector<2xf32>
    %373 = vector.multi_reduction <add>, %372, %cst_85 [1] : vector<2x8xf32> to vector<2xf32>
    %374 = vector.shape_cast %373 : vector<2xf32> to vector<2x1xf32>
    %375 = tpu.reciprocal %374 {approx = true} : vector<2x1xf32> -> vector<2x1xf32>
    %376 = vector.broadcast %375 : vector<2x1xf32> to vector<2x8xf32>
    %377 = arith.mulf %372, %376 : vector<2x8xf32>
    %378 = vector.shape_cast %377 : vector<2x8xf32> to vector<2x8x1xf32>
    %379 = vector.broadcast %378 : vector<2x8x1xf32> to vector<2x8x32xf32>
    %380 = arith.mulf %379, %3 : vector<2x8x32xf32>
    %cst_86 = arith.constant dense<0.000000e+00> : vector<2x32xf32>
    %381 = vector.multi_reduction <add>, %380, %cst_86 [1] : vector<2x8x32xf32> to vector<2x32xf32>
    %382 = tpu.concatenate %363, %381, %354 in 1 : vector<2x16xf32>, vector<2x32xf32>, vector<2x32xf32> -> vector<2x80xf32>
    %cst_87 = arith.constant dense<0.000000e+00> : vector<2x192xf32>
    %383 = tpu.matmul %382, %4, %cst_87 {dimension_numbers = #tpu.dot_dimension_numbers<[1], [0], [0], [1], [0, 0, 1, 1], [], []>} : vector<2x80xf32>, vector<80x192xf32>, vector<2x192xf32> -> vector<2x192xf32>
    %384 = vector.broadcast %5 : vector<1x192xf32> to vector<2x192xf32>
    %385 = arith.addf %383, %384 : vector<2x192xf32>
    %386 = vector.extract_strided_slice %385 {offsets = [0, 0], sizes = [2, 96], strides = [1, 1]} : vector<2x192xf32> to vector<2x96xf32>
    %387 = vector.extract_strided_slice %385 {offsets = [0, 96], sizes = [2, 96], strides = [1, 1]} : vector<2x192xf32> to vector<2x96xf32>
    %388 = vector.extract_strided_slice %386 {offsets = [0, 0], sizes = [2, 32], strides = [1, 1]} : vector<2x96xf32> to vector<2x32xf32>
    %389 = vector.extract_strided_slice %387 {offsets = [0, 0], sizes = [2, 32], strides = [1, 1]} : vector<2x96xf32> to vector<2x32xf32>
    %390 = arith.addf %388, %389 : vector<2x32xf32>
    %391 = arith.negf %390 : vector<2x32xf32>
    %392 = math.exp %391 : vector<2x32xf32>
    %cst_88 = arith.constant 1.000000e+00 : f32
    %393 = vector.broadcast %cst_88 : f32 to vector<2x32xf32>
    %394 = arith.addf %393, %392 : vector<2x32xf32>
    %395 = arith.divf %393, %394 : vector<2x32xf32>
    %396 = vector.extract_strided_slice %386 {offsets = [0, 32], sizes = [2, 32], strides = [1, 1]} : vector<2x96xf32> to vector<2x32xf32>
    %397 = vector.extract_strided_slice %387 {offsets = [0, 32], sizes = [2, 32], strides = [1, 1]} : vector<2x96xf32> to vector<2x32xf32>
    %398 = arith.addf %396, %397 : vector<2x32xf32>
    %399 = arith.negf %398 : vector<2x32xf32>
    %400 = math.exp %399 : vector<2x32xf32>
    %cst_89 = arith.constant 1.000000e+00 : f32
    %401 = vector.broadcast %cst_89 : f32 to vector<2x32xf32>
    %402 = arith.addf %401, %400 : vector<2x32xf32>
    %403 = arith.divf %401, %402 : vector<2x32xf32>
    %404 = vector.extract_strided_slice %386 {offsets = [0, 64], sizes = [2, 32], strides = [1, 1]} : vector<2x96xf32> to vector<2x32xf32>
    %405 = vector.extract_strided_slice %387 {offsets = [0, 64], sizes = [2, 32], strides = [1, 1]} : vector<2x96xf32> to vector<2x32xf32>
    %406 = arith.mulf %395, %405 : vector<2x32xf32>
    %407 = arith.addf %404, %406 : vector<2x32xf32>
    %408 = math.tanh %407 : vector<2x32xf32>
    %cst_90 = arith.constant 1.000000e+00 : f32
    %409 = vector.broadcast %cst_90 : f32 to vector<2x32xf32>
    %410 = arith.subf %409, %403 : vector<2x32xf32>
    %411 = arith.mulf %410, %408 : vector<2x32xf32>
    %412 = arith.mulf %403, %354 : vector<2x32xf32>
    %413 = arith.addf %411, %412 : vector<2x32xf32>
    %414 = tpu.concatenate %413, %381 in 1 : vector<2x32xf32>, vector<2x32xf32> -> vector<2x64xf32>
    %415 = arith.truncf %414 : vector<2x64xf32> to vector<2x64xbf16>
    %416 = arith.index_cast %c6_i32 : i32 to index
    %c0_91 = arith.constant 0 : index
    %c0_92 = arith.constant 0 : index
    %417 = vector.load %arg7[%416, %c0_91, %c0_92] : memref<8x2x64xbf16, #tpu.memory_space<vmem>>, vector<1x2x64xbf16>
    %418 = vector.shape_cast %417 : vector<1x2x64xbf16> to vector<2x64xbf16>
    %419 = vector.shape_cast %415 : vector<2x64xbf16> to vector<1x2x64xbf16>
    tpu.vector_store %arg7[%416, %c0_91, %c0_92], %419 {strides = array<i32>} : memref<8x2x64xbf16, #tpu.memory_space<vmem>>, vector<1x2x64xbf16>,
    %c7_i32 = arith.constant 7 : i32
    %420 = arith.index_cast %c7_i32 : i32 to index
    %c0_93 = arith.constant 0 : index
    %c0_94 = arith.constant 0 : index
    %421 = vector.load %arg2[%420, %c0_93, %c0_94] : memref<8x2x16xf32, #tpu.memory_space<vmem>>, vector<1x2x16xf32>
    %422 = vector.shape_cast %421 : vector<1x2x16xf32> to vector<2x16xf32>
    %423 = vector.shape_cast %413 : vector<2x32xf32> to vector<2x1x32xf32>
    %424 = vector.broadcast %423 : vector<2x1x32xf32> to vector<2x8x32xf32>
    %425 = arith.mulf %424, %3 : vector<2x8x32xf32>
    %cst_95 = arith.constant dense<0.000000e+00> : vector<2x8xf32>
    %426 = vector.multi_reduction <add>, %425, %cst_95 [2] : vector<2x8x32xf32> to vector<2x8xf32>
    %cst_96 = arith.constant dense<0xFF800000> : vector<2xf32>
    %427 = vector.multi_reduction <maximumf>, %426, %cst_96 [1] : vector<2x8xf32> to vector<2xf32>
    %428 = vector.shape_cast %427 : vector<2xf32> to vector<2x1xf32>
    %429 = vector.broadcast %428 : vector<2x1xf32> to vector<2x8xf32>
    %430 = arith.subf %426, %429 : vector<2x8xf32>
    %431 = math.exp %430 : vector<2x8xf32>
    %cst_97 = arith.constant dense<0.000000e+00> : vector<2xf32>
    %432 = vector.multi_reduction <add>, %431, %cst_97 [1] : vector<2x8xf32> to vector<2xf32>
    %433 = vector.shape_cast %432 : vector<2xf32> to vector<2x1xf32>
    %434 = tpu.reciprocal %433 {approx = true} : vector<2x1xf32> -> vector<2x1xf32>
    %435 = vector.broadcast %434 : vector<2x1xf32> to vector<2x8xf32>
    %436 = arith.mulf %431, %435 : vector<2x8xf32>
    %437 = vector.shape_cast %436 : vector<2x8xf32> to vector<2x8x1xf32>
    %438 = vector.broadcast %437 : vector<2x8x1xf32> to vector<2x8x32xf32>
    %439 = arith.mulf %438, %3 : vector<2x8x32xf32>
    %cst_98 = arith.constant dense<0.000000e+00> : vector<2x32xf32>
    %440 = vector.multi_reduction <add>, %439, %cst_98 [1] : vector<2x8x32xf32> to vector<2x32xf32>
    %441 = tpu.concatenate %422, %440, %413 in 1 : vector<2x16xf32>, vector<2x32xf32>, vector<2x32xf32> -> vector<2x80xf32>
    %cst_99 = arith.constant dense<0.000000e+00> : vector<2x192xf32>
    %442 = tpu.matmul %441, %4, %cst_99 {dimension_numbers = #tpu.dot_dimension_numbers<[1], [0], [0], [1], [0, 0, 1, 1], [], []>} : vector<2x80xf32>, vector<80x192xf32>, vector<2x192xf32> -> vector<2x192xf32>
    %443 = vector.broadcast %5 : vector<1x192xf32> to vector<2x192xf32>
    %444 = arith.addf %442, %443 : vector<2x192xf32>
    %445 = vector.extract_strided_slice %444 {offsets = [0, 0], sizes = [2, 96], strides = [1, 1]} : vector<2x192xf32> to vector<2x96xf32>
    %446 = vector.extract_strided_slice %444 {offsets = [0, 96], sizes = [2, 96], strides = [1, 1]} : vector<2x192xf32> to vector<2x96xf32>
    %447 = vector.extract_strided_slice %445 {offsets = [0, 0], sizes = [2, 32], strides = [1, 1]} : vector<2x96xf32> to vector<2x32xf32>
    %448 = vector.extract_strided_slice %446 {offsets = [0, 0], sizes = [2, 32], strides = [1, 1]} : vector<2x96xf32> to vector<2x32xf32>
    %449 = arith.addf %447, %448 : vector<2x32xf32>
    %450 = arith.negf %449 : vector<2x32xf32>
    %451 = math.exp %450 : vector<2x32xf32>
    %cst_100 = arith.constant 1.000000e+00 : f32
    %452 = vector.broadcast %cst_100 : f32 to vector<2x32xf32>
    %453 = arith.addf %452, %451 : vector<2x32xf32>
    %454 = arith.divf %452, %453 : vector<2x32xf32>
    %455 = vector.extract_strided_slice %445 {offsets = [0, 32], sizes = [2, 32], strides = [1, 1]} : vector<2x96xf32> to vector<2x32xf32>
    %456 = vector.extract_strided_slice %446 {offsets = [0, 32], sizes = [2, 32], strides = [1, 1]} : vector<2x96xf32> to vector<2x32xf32>
    %457 = arith.addf %455, %456 : vector<2x32xf32>
    %458 = arith.negf %457 : vector<2x32xf32>
    %459 = math.exp %458 : vector<2x32xf32>
    %cst_101 = arith.constant 1.000000e+00 : f32
    %460 = vector.broadcast %cst_101 : f32 to vector<2x32xf32>
    %461 = arith.addf %460, %459 : vector<2x32xf32>
    %462 = arith.divf %460, %461 : vector<2x32xf32>
    %463 = vector.extract_strided_slice %445 {offsets = [0, 64], sizes = [2, 32], strides = [1, 1]} : vector<2x96xf32> to vector<2x32xf32>
    %464 = vector.extract_strided_slice %446 {offsets = [0, 64], sizes = [2, 32], strides = [1, 1]} : vector<2x96xf32> to vector<2x32xf32>
    %465 = arith.mulf %454, %464 : vector<2x32xf32>
    %466 = arith.addf %463, %465 : vector<2x32xf32>
    %467 = math.tanh %466 : vector<2x32xf32>
    %cst_102 = arith.constant 1.000000e+00 : f32
    %468 = vector.broadcast %cst_102 : f32 to vector<2x32xf32>
    %469 = arith.subf %468, %462 : vector<2x32xf32>
    %470 = arith.mulf %469, %467 : vector<2x32xf32>
    %471 = arith.mulf %462, %413 : vector<2x32xf32>
    %472 = arith.addf %470, %471 : vector<2x32xf32>
    %473 = tpu.concatenate %472, %440 in 1 : vector<2x32xf32>, vector<2x32xf32> -> vector<2x64xf32>
    %474 = arith.truncf %473 : vector<2x64xf32> to vector<2x64xbf16>
    %475 = arith.index_cast %c7_i32 : i32 to index
    %c0_103 = arith.constant 0 : index
    %c0_104 = arith.constant 0 : index
    %476 = vector.load %arg7[%475, %c0_103, %c0_104] : memref<8x2x64xbf16, #tpu.memory_space<vmem>>, vector<1x2x64xbf16>
    %477 = vector.shape_cast %476 : vector<1x2x64xbf16> to vector<2x64xbf16>
    %478 = vector.shape_cast %474 : vector<2x64xbf16> to vector<1x2x64xbf16>
    tpu.vector_store %arg7[%475, %c0_103, %c0_104], %478 {strides = array<i32>} : memref<8x2x64xbf16, #tpu.memory_space<vmem>>, vector<1x2x64xbf16>,
    %c8_i32 = arith.constant 8 : i32
    %c0_105 = arith.constant 0 : index
    %c0_106 = arith.constant 0 : index
    %479 = vector.load %arg8[%c0_105, %c0_106] : memref<2x32xf32, #tpu.memory_space<vmem>>, vector<2x32xf32>
    tpu.vector_store %arg8[%c0_105, %c0_106], %472 {strides = array<i32>} : memref<2x32xf32, #tpu.memory_space<vmem>>, vector<2x32xf32>,
    return
  }
  func.func @transform_0(%arg0: i32, %arg1: i32) -> (i32, i32, i32) {
    %c0_i32 = arith.constant 0 : i32
    %c0_i32_0 = arith.constant 0 : i32
    return %arg1, %arg0, %c0_i32 : i32, i32, i32
  }
  func.func @transform_1(%arg0: i32, %arg1: i32) -> (i32, i32, i32) {
    %c0_i32 = arith.constant 0 : i32
    %c0_i32_0 = arith.constant 0 : i32
    %c0_i32_1 = arith.constant 0 : i32
    return %arg0, %c0_i32, %c0_i32_0 : i32, i32, i32
  }
  func.func @transform_2(%arg0: i32, %arg1: i32) -> (i32, i32) {
    %c0_i32 = arith.constant 0 : i32
    %c0_i32_0 = arith.constant 0 : i32
    return %arg0, %c0_i32 : i32, i32
  }
  func.func @transform_3(%arg0: i32, %arg1: i32) -> (i32, i32) {
    %c0_i32 = arith.constant 0 : i32
    %c0_i32_0 = arith.constant 0 : i32
    %c0_i32_1 = arith.constant 0 : i32
    return %c0_i32, %c0_i32_0 : i32, i32
  }
  func.func @transform_4(%arg0: i32, %arg1: i32) -> (i32, i32) {
    %c0_i32 = arith.constant 0 : i32
    %c0_i32_0 = arith.constant 0 : i32
    %c0_i32_1 = arith.constant 0 : i32
    return %c0_i32, %c0_i32_0 : i32, i32
  }
  func.func @transform_5(%arg0: i32, %arg1: i32) -> (i32, i32, i32) {
    %c0_i32 = arith.constant 0 : i32
    %c0_i32_0 = arith.constant 0 : i32
    return %arg1, %arg0, %c0_i32 : i32, i32, i32
  }
}

</mosaic_0001>

<bundles_post_ra>
// kernel: tpu_custom_call.1
= control target key start
LH: loop header
LB: loop body
LE: loop exit
PB: predicated region body
PF: predicated region fallthrough
CT: control target
= control target key end

     0   :  { %10 = vsyncpa [#allocation4], 0  ;;  %s3493_s0 = inlined_call_operand.hbm [shape: f32[8,2,16], index: 0, kind: input, shape index: {}]   ;;  %s3494_s1 = inlined_call_operand.hbm [shape: f32[2,8,32], index: 1, kind: input, shape index: {}]   ;;  %s3495_s2 = inlined_call_operand.vmem [shape: f32[2,32], index: 2, kind: input, shape index: {}]   ;;  %s3496_s3 = inlined_call_operand.hbm [shape: f32[80,192], index: 3, kind: input, shape index: {}]   ;;  %s3497_s4 = inlined_call_operand.vmem [shape: f32[1,192], index: 4, kind: input, shape index: {}]   ;;  %s3498_s5 = inlined_call_operand.hbm [shape: bf16[8,2,64], index: 5, kind: output, shape index: {}]  }
   0x1   :  { %11 = vsyncpa [#allocation7], 0 }
   0x2   :  { %12 = vsyncpa [#allocation5], 0  ;;  %s2829_s18 = smov [#allocation6]   ;;  %s2735_s22 = scalar_lea.hbm %s3494_s1, 256 }
   0x3   :  { %s30_s19 = sshll.u32 %s2829_s18, 4  ;;  %p2736_p0 = scmp.ne.s32.totalorder %s3494_s1, %s2735_s22  ;;  %s31_s19 = int_to_ptr.vmem [resolvable:$true] %s30_s19 }
   0x4   :  { %p2739_p1 = scmp.lt.u32.totalorder %s2735_s22, %s3494_s1 }
   0x6   :  { %p2741_p2 = pnand %p2739_p1, %p2736_p0 }
   0x8   :  { %2744 = shalt.err (!%p2741_p2)
}
   0x9   :  { %s2745_s27 = scalar_lea.vmem %s31_s19, 256  ;;  %p2750_p4 = scmp.lt.s32.totalorder %s31_s19, %s31_s19 }
   0xa   :  { %p2746_p3 = scmp.ne.s32.totalorder %s31_s19, %s2745_s27  ;;  %p2751_p5 = scmp.lt.s32.totalorder %s2745_s27, %s2745_s27 }
   0xc   :  { %p2752_p6 = por %p2751_p5, %p2750_p4 }
   0xe   :  { %p2753_p7 = pnand %p2752_p6, %p2746_p3 }
  0x10   :  { %2756 = shalt.err (!%p2753_p7)
}
  0x11   :  { %s2830_s28 = smov 128   ;;  %s2831_s29 = smov 8  }
  0x12   :  { %36 = dma.hbm_to_vmem [thread:$0]  %s3494_s1, 256, %s31_s19, [#allocation7], %s2830_s28, %s2830_s28, %s2831_s29  }
  0x13   :  { %s2832_s7 = smov [#allocation3]   ;;  %s2757_s11 = scalar_lea.hbm %s3493_s0, 256 }
  0x14   :  { %s18_s8 = sshll.u32 %s2832_s7, 4  ;;  %p2758_p8 = scmp.ne.s32.totalorder %s3493_s0, %s2757_s11  ;;  %s19_s8 = int_to_ptr.vmem [resolvable:$true] %s18_s8 }
  0x15   :  { %p2761_p9 = scmp.lt.u32.totalorder %s2757_s11, %s3493_s0 }
  0x17   :  { %p2763_p10 = pnand %p2761_p9, %p2758_p8 }
  0x19   :  { %2766 = shalt.err (!%p2763_p10)
}
  0x1a   :  { %s2767_s16 = scalar_lea.vmem %s19_s8, 256  ;;  %p2772_p12 = scmp.lt.s32.totalorder %s19_s8, %s19_s8 }
  0x1b   :  { %p2768_p11 = scmp.ne.s32.totalorder %s19_s8, %s2767_s16  ;;  %p2773_p13 = scmp.lt.s32.totalorder %s2767_s16, %s2767_s16 }
  0x1d   :  { %p2774_p0 = por %p2773_p13, %p2772_p12 }
  0x1f   :  { %p2775_p1 = pnand %p2774_p0, %p2768_p11 }
  0x21   :  { %2778 = shalt.err (!%p2775_p1)
}
  0x22   :  { %s2833_s1 = smov 32   ;;  %s2834_s17 = smov 2  }
  0x23   :  { %24 = dma.hbm_to_vmem [thread:$0]  %s3493_s0, 256, %s19_s8, [#allocation4], %s2833_s1, %s2833_s1, %s2834_s17  }
  0x24   :  { %s2835_s20 = smov [#allocation8]   ;;  %s2779_s24 = scalar_lea.hbm %s3496_s3, 2560 }
  0x25   :  { %s44_s21 = sshll.u32 %s2835_s20, 4  ;;  %p2780_p2 = scmp.ne.s32.totalorder %s3496_s3, %s2779_s24  ;;  %s45_s21 = int_to_ptr.vmem [resolvable:$true] %s44_s21 }
  0x26   :  { %p2783_p3 = scmp.lt.u32.totalorder %s2779_s24, %s3496_s3 }
  0x28   :  { %p2785_p4 = pnand %p2783_p3, %p2780_p2 }
  0x2a   :  { %2788 = shalt.err (!%p2785_p4)
}
  0x2b   :  { %s2789_s29 = scalar_lea.vmem %s45_s21, 2560  ;;  %p2794_p6 = scmp.lt.s32.totalorder %s45_s21, %s45_s21 }
  0x2c   :  { %p2790_p5 = scmp.ne.s32.totalorder %s45_s21, %s2789_s29  ;;  %p2795_p7 = scmp.lt.s32.totalorder %s2789_s29, %s2789_s29 }
  0x2e   :  { %p2796_p8 = por %p2795_p7, %p2794_p6 }
  0x30   :  { %p2797_p9 = pnand %p2796_p8, %p2790_p5 }
  0x32   :  { %2800 = shalt.err (!%p2797_p9)
}
  0x33   :  { %s2836_s0 = smov 256   ;;  %s2837_s30 = smov 16  }
  0x34   :  { %50 = dma.hbm_to_vmem [thread:$0]  %s3496_s3, 2560, %s45_s21, [#allocation7], %s2836_s0, %s2836_s0, %s2837_s30  }
  0x35   :  { %2823 = dma.done.wait [#allocation4], 256  }
  0x36   :  { %2824 = vsyncadd [#allocation4], 4294967040 }
  0x37   :  { %2825 = dma.done.wait [#allocation7], 2816  }
  0x38   :  { %2826 = vsyncadd [#allocation7], 4294964480  ;;  %v98_v0 = vlaneseq  ;;  %v2838_v3 = vmov 1966171168   ;;  %vm67_vm0 = vcmask 254976   ;;  %v2930_v14 = vld [vmem:[#allocation6] sm:$0xff] }
  0x39   :  { %v96_v4 = vunpack.c.l.s4 %v2838_v3  ;;  %v66_v6 = vld [vmem:[%s3495_s2] sm:$0x3]  ;;  %vm129_vm1 = vcmask 261120   ;;  %vm148_vm2 = vcmask 1041409   ;;  %vm151_vm3 = vcmask 58368   ;;  %v72_v52 = vld [vmem:[#allocation8 + $0x8] sm:$0xff] }
  0x3a   :  { %v99_v1 = vshrl.u32 %v98_v0, 7  ;;  %v139_v2 = vand.u32 127, %v98_v0  ;;  %68 = vst.msk [vmem:[#allocation2] sm:$0x3] %vm67_vm0, %v66_v6  ;;  %v2934_v17 = vld [vmem:[#allocation6 + $0x8] sm:$0xff]  ;;  %v2839_v29 = vmov 0  }
  0x3b   :  { %v97_v7 = vunpack.c.0.s8 %v96_v4  ;;  %2569 = vset.pattern.permute.xlu0 %v2839_v29  ;;  %2568 = vset.pattern.permute.xlu1 %v2839_v29  ;;  %v74_v53 = vld [vmem:[#allocation8 + $0x18] sm:$0xff]  ;;  %v71_v54 = vld [vmem:[#allocation8] sm:$0xff]  ;;  %s2840_s2 = smov 48   ;;  %v73_v56 = vld [vmem:[#allocation8 + $0x10] sm:$0xff]  ;;  %vm242_vm4 = vcmask 130048   ;;  %vm244_vm5 = vcmask 392192  }
  0x3c   :  { %v2915_v5 = vsub.s32 %v139_v2, %v99_v1  ;;  %v2927_v11 = vsub.s32 0, %v99_v1  ;;  %v2945_v30 = vsub.s32 1, %v99_v1  ;;  %v2956_v55 = vpack.c.bf16 %v74_v53, %v72_v52  ;;  %v76_v57 = vld [vmem:[#allocation8 + $0x28] sm:$0xff]  ;;  %v78_v58 = vld [vmem:[#allocation8 + $0x38] sm:$0xff]  ;;  %v75_v61 = vld [vmem:[#allocation8 + $0x20] sm:$0xff]  ;;  %s2842_s11 = smov 96  }
  0x3d   :  { %v2921_v8 = vsub.s32 %v97_v7, %v99_v1  ;;  %v2958_v59 = vpack.c.bf16 %v73_v56, %v71_v54  ;;  %v2960_v60 = vpack.c.bf16 %v78_v58, %v76_v57  ;;  %v77_v62 = vld [vmem:[#allocation8 + $0x30] sm:$0xff]  ;;  %v80_v63 = vld [vmem:[#allocation8 + $0x48] sm:$0xff]  ;;  %v82_v0 = vld [vmem:[#allocation8 + $0x58] sm:$0xff]  ;;  %vm257_vm6 = vcmask 654336   ;;  %s2844_s12 = smov [#allocation9]  }
  0x3e   :  { %2392 = vmatprep.subr.bf16.mxu0 %v2956_v55  ;;  %2412 = vmatprep.subr.bf16.mxu1 %v2956_v55  ;;  %v2965_v1 = vpack.c.bf16 %v77_v62, %v75_v61  ;;  %v2969_v2 = vpack.c.bf16 %v82_v0, %v80_v63  ;;  %v79_v3 = vld [vmem:[#allocation8 + $0x40] sm:$0xff]  ;;  %v81_v4 = vld [vmem:[#allocation8 + $0x50] sm:$0xff]  ;;  %v84_v6 = vld [vmem:[#allocation8 + $0x68] sm:$0xff]  ;;  %vm384_vm7 = vcmask 516096   ;;  %s2354_s13 = sshll.u32 %s2844_s12, 4  ;;  %s2355_s13 = int_to_ptr.vmem [resolvable:$true] %s2354_s13 }
  0x3f   :  { %2394 = vmatpush1.bf16.msra.mxu0 %v2958_v59  ;;  %2414 = vmatpush1.bf16.msra.mxu1 %v2958_v59  ;;  %v86_v7 = vld [vmem:[#allocation8 + $0x78] sm:$0xff]  ;;  %s2801_s14 = scalar_lea.vmem %s2355_s13, 128  ;;  %p2806_p11 = scmp.lt.s32.totalorder %s2355_s13, %s2355_s13 }
  0x40   :  { %2396 = vmatprep.subr.bf16.mxu0 %v2960_v60  ;;  %2416 = vmatprep.subr.bf16.mxu1 %v2960_v60  ;;  %p2802_p10 = scmp.ne.s32.totalorder %s2355_s13, %s2801_s14  ;;  %p2807_p12 = scmp.lt.s32.totalorder %s2801_s14, %s2801_s14 }
  0x41   :  { %v2923_v9 = vld [vmem:[#allocation2] sm:$0x3] }
  0x42   :  { %v101_v10 = vrot.slane %v2923_v9, %v2921_v8  ;;  %p2808_p13 = por %p2807_p12, %p2806_p11 }
  0x43   :  { %2398 = vmatpush1.bf16.msra.mxu0 %v2965_v1  ;;  %2418 = vmatpush1.bf16.msra.mxu1 %v2965_v1 }
  0x44   :  { %v109_v12 = vrot.slane %v101_v10, %v2921_v8  ;;  %v102_v13 = vcombine.high %v101_v10, %v101_v10  ;;  %v2973_v10 = vpack.c.bf16 %v81_v4, %v79_v3  ;;  %2400 = vmatprep.subr.bf16.mxu0 %v2969_v2  ;;  %2420 = vmatprep.subr.bf16.mxu1 %v2969_v2  ;;  %p2809_p0 = pnand %p2808_p13, %p2802_p10 }
  0x46   :  { %v120_v15 = vrot.slane %v109_v12, %v2927_v11  ;;  %v116_v16 = vrot.slane %v102_v13, %v2921_v8  ;;  %v2977_v12 = vpack.c.bf16 %v86_v7, %v84_v6  ;;  %v83_v13 = vld [vmem:[#allocation8 + $0x60] sm:$0xff] }
  0x47   :  { %2402 = vmatpush1.bf16.msra.mxu0 %v2973_v10  ;;  %2422 = vmatpush1.bf16.msra.mxu1 %v2973_v10 }
  0x48   :  { %v127_v18 = vmul.f32 %v120_v15, %v2930_v14  ;;  %v124_v19 = vrot.slane %v116_v16, %v2927_v11  ;;  %v85_v15 = vld [vmem:[#allocation8 + $0x70] sm:$0xff]  ;;  %v88_v16 = vld [vmem:[#allocation8 + $0x88] sm:$0xff]  ;;  %2404 = vmatprep.subr.bf16.mxu0 %v2977_v12  ;;  %2424 = vmatprep.subr.bf16.mxu1 %v2977_v12 }
  0x4a   :  { %v130_v20 = vsel %vm129_vm1, %v127_v18, 0.0  ;;  %v128_v21 = vmul.f32 %v124_v19, %v2934_v17  ;;  %v90_v18 = vld [vmem:[#allocation8 + $0x98] sm:$0xff]  ;;  %v2981_v19 = vpack.c.bf16 %v85_v15, %v83_v13 }
  0x4b   :  { %131 = vadd.xlane.f32.xlu0 %v130_v20  ;;  %v2985_v20 = vpack.c.bf16 %v90_v18, %v88_v16 }
  0x4c   :  { %v133_v22 = vsel %vm129_vm1, %v128_v21, 0.0  ;;  %v87_v21 = vld [vmem:[#allocation8 + $0x80] sm:$0xff]  ;;  %2406 = vmatpush1.bf16.msra.mxu0 %v2981_v19  ;;  %2426 = vmatpush1.bf16.msra.mxu1 %v2981_v19 }
  0x4d   :  { %2408 = vmatprep.subr.bf16.mxu0 %v2985_v20  ;;  %2428 = vmatprep.subr.bf16.mxu1 %v2985_v20 }
  0x4f   :  { %134 = vadd.xlane.f32.xlu0 %v133_v22  ;;  %v89_v22 = vld [vmem:[#allocation8 + $0x90] sm:$0xff] }
  0xd8   :  { %v132_v23 = vpop.xlane.xlu0 %131 }
  0xd9   :  { %v143_v25 = vrot.slane %v132_v23, %v2915_v5 }
  0xdc   :  { %v135_v24 = vpop.xlane.xlu0 %134 }
  0xdd   :  { %v147_v26 = vrot.slane %v135_v24, %v2915_v5 }
  0xdf   :  { %v149_v27 = vsel %vm148_vm2, %v147_v26, %v143_v25 }
  0xe0   :  { %v152_v28 = vsel %vm151_vm3, %v149_v27, -inf }
  0xe1   :  { %153 = vmax.xlane.f32.xlu1 %v152_v28 }
 0x16e   :  { %v154_v31 = vpop.xlane.xlu1 %153 }
 0x16f   :  { %v159_v32 = vrot.slane %v154_v31, %v2927_v11  ;;  %v163_v33 = vrot.slane %v154_v31, %v2945_v30 }
 0x171   :  { %v166_v34 = vsub.f32 %v132_v23, %v159_v32  ;;  %v167_v35 = vsub.f32 %v135_v24, %v163_v33  ;;  %v2989_v23 = vpack.c.bf16 %v89_v22, %v87_v21 }
 0x173   :  { %v168_v36 = vmul.f32 1.442695, %v166_v34  ;;  %v170_v37 = vmul.f32 1.442695, %v167_v35  ;;  %2410 = vmatpush1.bf16.msra.mxu0 %v2989_v23  ;;  %2430 = vmatpush1.bf16.msra.mxu1 %v2989_v23  ;;  %v2841_v35 = vmov 0.0  }
 0x174   :  { %2432 = vmatprep.subr.bf16.mxu0 %v2956_v55  ;;  %2452 = vmatprep.subr.bf16.mxu1 %v2956_v55 }
 0x175   :  { %2605 = vpow2.f32 %v168_v36  ;;  %325 = vmatprep.mubr.f32.mxu0 %v2841_v35  ;;  %615 = vmatprep.mubr.f32.mxu1 %v2841_v35 }
 0x176   :  { %2607 = vpow2.f32 %v170_v37 }
 0x17f   :  { %v2606_v38 = vpop.eup %2605 }
 0x180   :  { %v2608_v39 = vpop.eup %2607  ;;  %175 = vperm.xlu1 %2568, %v2606_v38  }
 0x181   :  { %178 = vperm.xlu0 %2569, %v2608_v39  }
 0x1ff   :  { %v176_v40 = vpop.permute.xlu1 %175 }
 0x200   :  { %v179_v41 = vpop.permute.xlu0 %178  ;;  %v183_v42 = vrot.slane %v176_v40, %v2915_v5 }
 0x201   :  { %v187_v43 = vrot.slane %v179_v41, %v2915_v5 }
 0x203   :  { %v188_v44 = vsel %vm148_vm2, %v187_v43, %v183_v42 }
 0x204   :  { %v190_v45 = vsel %vm151_vm3, %v188_v44, 0.0 }
 0x205   :  { %191 = vadd.xlane.f32.xlu1 %v190_v45  ;;  %v93_v45 = vld [vmem:[#allocation3] sm:$0x3] }
 0x292   :  { %v192_v46 = vpop.xlane.xlu1 %191 }
 0x293   :  { %2609 = vrcp.f32 %v192_v46 }
 0x29d   :  { %v2610_v47 = vpop.eup %2609 }
 0x29e   :  { %v198_v48 = vrot.slane %v2610_v47, %v2927_v11  ;;  %v202_v50 = vrot.slane %v2610_v47, %v2945_v30 }
 0x2a0   :  { %v205_v49 = vmul.f32 %v2606_v38, %v198_v48  ;;  %v206_v51 = vmul.f32 %v2608_v39, %v202_v50  ;;  %v91_v50 = vld [vmem:[%s3497_s4] sm:$0x3]  ;;  %s2843_s4 = smov 64  }
 0x2a1   :  { %v3030_v52 = vrot.slane %v91_v50, %v2945_v30 }
 0x2a2   :  { %209 = vperm.xlu0 %2569, %v205_v49  }
 0x2a6   :  { %214 = vperm.xlu0 %2569, %v206_v51   ;;  %v3027_v51 = vrot.slane %v91_v50, %v2927_v11 }
 0x2aa   :  { %239 = vrot.lane.b32.xlu0 %v2923_v9, %s2840_s2 }
 0x321   :  { %v210_v24 = vpop.permute.xlu0 %209 }
 0x322   :  { %v217_v25 = vmul.f32 %v210_v24, %v2930_v14 }
 0x324   :  { %v219_v26 = vsel %vm129_vm1, %v217_v25, 0.0 }
 0x325   :  { %v220_v27 = vrot.slane %v219_v26, 4  ;;  %v215_v28 = vpop.permute.xlu0 %214 }
 0x326   :  { %v218_v29 = vmul.f32 %v215_v28, %v2934_v17 }
 0x327   :  { %v221_v31 = vadd.f32 %v220_v27, %v219_v26 }
 0x328   :  { %v226_v32 = vsel %vm129_vm1, %v218_v29, 0.0 }
 0x329   :  { %v222_v33 = vrot.slane %v221_v31, 2  ;;  %v227_v34 = vrot.slane %v226_v32, 4  ;;  %v240_v46 = vpop.permute.xlu0 %239 }
 0x32b   :  { %v223_v36 = vadd.f32 %v222_v33, %v221_v31  ;;  %v228_v37 = vadd.f32 %v227_v34, %v226_v32 }
 0x32d   :  { %v229_v38 = vrot.slane %v228_v37, 2  ;;  %v224_v40 = vrot.slane %v223_v36, 1 }
 0x32f   :  { %v230_v39 = vadd.f32 %v229_v38, %v228_v37  ;;  %v225_v42 = vadd.f32 %v224_v40, %v223_v36 }
 0x331   :  { %v231_v41 = vrot.slane %v230_v39, 1 }
 0x333   :  { %v232_v43 = vadd.f32 %v231_v41, %v230_v39 }
 0x335   :  { %v3005_v44 = vsel %vm148_vm2, %v232_v43, %v225_v42 }
 0x336   :  { %236 = vrot.lane.b32.xlu1 %v3005_v44, %s2837_s30 }
 0x3a8   :  { %v237_v47 = vpop.permute.xlu1 %236 }
 0x3a9   :  { %v243_v48 = vsel %vm242_vm4, %v93_v45, %v237_v47 }
 0x3aa   :  { %v245_v49 = vsel %vm244_vm5, %v243_v48, %v240_v46 }
 0x3ab   :  { %2367 = vmatmul.mubr.msk.f32.vlgmr.msra.gmra.mrb[0].mxu0 %vm257_vm6, %v245_v49 }
 0x3ac   :  { %2434 = vmatpush1.bf16.msra.mxu0 %v2958_v59  ;;  %894 = vmatprep.mubr.f32.mxu0 %v2841_v35 }
 0x3ad   :  { %2436 = vmatprep.subr.bf16.mxu0 %v2960_v60 }
 0x3b0   :  { %2438 = vmatpush1.bf16.msra.mxu0 %v2965_v1 }
 0x3b1   :  { %2440 = vmatprep.subr.bf16.mxu0 %v2969_v2 }
 0x3b4   :  { %2442 = vmatpush1.bf16.msra.mxu0 %v2973_v10 }
 0x3b5   :  { %2444 = vmatprep.subr.bf16.mxu0 %v2977_v12 }
 0x3b8   :  { %2446 = vmatpush1.bf16.msra.mxu0 %v2981_v19 }
 0x3b9   :  { %2448 = vmatprep.subr.bf16.mxu0 %v2985_v20 }
 0x3bc   :  { %2450 = vmatpush1.bf16.msra.mxu0 %v2989_v23 }
 0x3bd   :  { %2472 = vmatprep.subr.bf16.mxu0 %v2956_v55 }
 0x47e   :  { %v327_v53 = vpop.f32.mrb[0].mxu0 }
 0x47f   :  { %v328_v54 = vadd.f32 %v327_v53, %v3027_v51  ;;  %v329_v56 = vpop.f32.mrb[1].mxu0 }
 0x480   :  { %v330_v57 = vadd.f32 %v329_v56, %v3030_v52 }
 0x481   :  { %333 = vrot.lane.b32.xlu0 %v328_v54, %s2833_s1 }
 0x482   :  { %344 = vrot.lane.b32.xlu1 %v330_v57, %s2833_s1 }
 0x485   :  { %354 = vrot.lane.b32.xlu0 %v330_v57, %s2842_s11 }
 0x486   :  { %370 = vrot.lane.b32.xlu1 %v2923_v9, %s2833_s1 }
 0x48a   :  { %424 = vrot.lane.b32.xlu1 %v2934_v17, %s2833_s1 }
 0x4f3   :  { %v334_v58 = vpop.permute.xlu0 %333 }
 0x4f4   :  { %v336_v61 = vadd.f32 %v334_v58, %v328_v54  ;;  %v345_v15 = vpop.permute.xlu1 %344 }
 0x4f5   :  { %v347_v16 = vadd.f32 %v345_v15, %v328_v54 }
 0x4f6   :  { %v2368_v62 = vmul.f32 -1.442695, %v336_v61 }
 0x4f7   :  { %v355_v4 = vpop.permute.xlu0 %354  ;;  %v2369_v18 = vmul.f32 -1.442695, %v347_v16 }
 0x4f8   :  { %2611 = vpow2.f32 %v2368_v62  ;;  %v371_v25 = vpop.permute.xlu1 %370 }
 0x4fc   :  { %v3054_v39 = vpop.permute.xlu1 %424 }
 0x502   :  { %v2612_v63 = vpop.eup %2611 }
 0x503   :  { %v340_v0 = vadd.f32 1.0, %v2612_v63 }
 0x505   :  { %2613 = vrcp.f32 %v340_v0 }
 0x50f   :  { %v2614_v3 = vpop.eup %2613 }
 0x510   :  { %v357_v6 = vmul.f32 %v2614_v3, %v355_v4 }
 0x512   :  { %359 = vrot.lane.b32.xlu0 %v357_v6, %s2843_s4 }
 0x584   :  { %v360_v7 = vpop.permute.xlu0 %359 }
 0x585   :  { %v362_v13 = vadd.f32 %v360_v7, %v328_v54 }
 0x587   :  { %2615 = vtanh.f32 %v362_v13 }
 0x588   :  { %2617 = vpow2.f32 %v2369_v18 }
 0x591   :  { %v2616_v9 = vpop.eup %2615 }
 0x592   :  { %366 = vrot.lane.b32.xlu0 %v2616_v9, %s2842_s11  ;;  %v2618_v21 = vpop.eup %2617 }
 0x593   :  { %v351_v22 = vadd.f32 1.0, %v2618_v21 }
 0x595   :  { %2619 = vrcp.f32 %v351_v22 }
 0x596   :  { %422 = vrot.lane.b32.xlu0 %v2930_v14, %s2833_s1 }
 0x59f   :  { %v2620_v24 = vpop.eup %2619 }
 0x5a0   :  { %v364_v26 = vsub.f32 1.0, %v2620_v24  ;;  %v373_v28 = vmul.f32 %v2620_v24, %v371_v25 }
 0x604   :  { %v367_v27 = vpop.permute.xlu0 %366 }
 0x605   :  { %v369_v29 = vmul.f32 %v367_v27, %v364_v26 }
 0x607   :  { %v3045_v31 = vadd.f32 %v373_v28, %v369_v29 }
 0x608   :  { %v3050_v36 = vpop.permute.xlu0 %422 }
 0x609   :  { %v394_v32 = vrot.slane %v3045_v31, %v2921_v8 }
 0x60b   :  { %v402_v33 = vrot.slane %v394_v32, %v2921_v8  ;;  %v395_v34 = vcombine.high %v394_v32, %v394_v32 }
 0x60d   :  { %v413_v37 = vrot.slane %v402_v33, %v2927_v11  ;;  %v409_v38 = vrot.slane %v395_v34, %v2921_v8 }
 0x60f   :  { %v428_v40 = vmul.f32 %v3050_v36, %v413_v37  ;;  %v417_v41 = vrot.slane %v409_v38, %v2927_v11 }
 0x611   :  { %432 = vrot.lane.b32.xlu0 %v428_v40, %s2842_s11  ;;  %v429_v42 = vmul.f32 %v3054_v39, %v417_v41 }
 0x613   :  { %434 = vrot.lane.b32.xlu1 %v429_v42, %s2842_s11 }
 0x683   :  { %v433_v43 = vpop.permute.xlu0 %432 }
 0x684   :  { %v438_v45 = vsel %vm129_vm1, %v433_v43, 0.0 }
 0x685   :  { %439 = vadd.xlane.f32.xlu0 %v438_v45  ;;  %v435_v46 = vpop.permute.xlu1 %434 }
 0x686   :  { %v441_v47 = vsel %vm129_vm1, %v435_v46, 0.0 }
 0x687   :  { %442 = vadd.xlane.f32.xlu1 %v441_v47 }
 0x712   :  { %v440_v48 = vpop.xlane.xlu0 %439 }
 0x713   :  { %v449_v50 = vrot.slane %v440_v48, %v2915_v5 }
 0x714   :  { %v443_v49 = vpop.xlane.xlu1 %442 }
 0x715   :  { %v453_v53 = vrot.slane %v443_v49, %v2915_v5 }
 0x717   :  { %v454_v54 = vsel %vm148_vm2, %v453_v53, %v449_v50 }
 0x718   :  { %v456_v56 = vsel %vm151_vm3, %v454_v54, -inf }
 0x719   :  { %457 = vmax.xlane.f32.xlu0 %v456_v56 }
 0x7a6   :  { %v458_v57 = vpop.xlane.xlu0 %457 }
 0x7a7   :  { %v463_v58 = vrot.slane %v458_v57, %v2927_v11  ;;  %v467_v61 = vrot.slane %v458_v57, %v2945_v30  ;;  %v387_v57 = vld [vmem:[#allocation3 + $0x2] sm:$0x3] }
 0x7a9   :  { %v470_v62 = vsub.f32 %v440_v48, %v463_v58  ;;  %v471_v63 = vsub.f32 %v443_v49, %v467_v61 }
 0x7ab   :  { %v472_v0 = vmul.f32 1.442695, %v470_v62  ;;  %v474_v3 = vmul.f32 1.442695, %v471_v63 }
 0x7ad   :  { %2621 = vpow2.f32 %v472_v0 }
 0x7ae   :  { %2623 = vpow2.f32 %v474_v3 }
 0x7b7   :  { %v2622_v4 = vpop.eup %2621 }
 0x7b8   :  { %v2624_v6 = vpop.eup %2623  ;;  %479 = vperm.xlu0 %2569, %v2622_v4  }
 0x7b9   :  { %482 = vperm.xlu1 %2568, %v2624_v6  }
 0x837   :  { %v480_v7 = vpop.permute.xlu0 %479 }
 0x838   :  { %v483_v13 = vpop.permute.xlu1 %482  ;;  %v487_v9 = vrot.slane %v480_v7, %v2915_v5 }
 0x839   :  { %v491_v15 = vrot.slane %v483_v13, %v2915_v5 }
 0x83b   :  { %v492_v16 = vsel %vm148_vm2, %v491_v15, %v487_v9 }
 0x83c   :  { %v494_v18 = vsel %vm151_vm3, %v492_v16, 0.0 }
 0x83d   :  { %495 = vadd.xlane.f32.xlu1 %v494_v18 }
 0x8ca   :  { %v496_v21 = vpop.xlane.xlu1 %495 }
 0x8cb   :  { %2625 = vrcp.f32 %v496_v21 }
 0x8d5   :  { %v2626_v22 = vpop.eup %2625 }
 0x8d6   :  { %v502_v24 = vrot.slane %v2626_v22, %v2927_v11  ;;  %v506_v26 = vrot.slane %v2626_v22, %v2945_v30 }
 0x8d8   :  { %v509_v25 = vmul.f32 %v2622_v4, %v502_v24  ;;  %v510_v27 = vmul.f32 %v2624_v6, %v506_v26 }
 0x8da   :  { %513 = vperm.xlu0 %2569, %v509_v25  }
 0x8de   :  { %518 = vperm.xlu0 %2569, %v510_v27  }
 0x959   :  { %v514_v28 = vpop.permute.xlu0 %513 }
 0x95a   :  { %v521_v29 = vmul.f32 %v514_v28, %v2930_v14 }
 0x95c   :  { %v523_v32 = vsel %vm129_vm1, %v521_v29, 0.0 }
 0x95d   :  { %v524_v33 = vrot.slane %v523_v32, 4  ;;  %v519_v34 = vpop.permute.xlu0 %518 }
 0x95e   :  { %v522_v37 = vmul.f32 %v519_v34, %v2934_v17 }
 0x95f   :  { %v525_v38 = vadd.f32 %v524_v33, %v523_v32 }
 0x960   :  { %v530_v40 = vsel %vm129_vm1, %v522_v37, 0.0 }
 0x961   :  { %v526_v41 = vrot.slane %v525_v38, 2  ;;  %v531_v42 = vrot.slane %v530_v40, 4 }
 0x963   :  { %v527_v43 = vadd.f32 %v526_v41, %v525_v38  ;;  %v532_v45 = vadd.f32 %v531_v42, %v530_v40 }
 0x965   :  { %v533_v46 = vrot.slane %v532_v45, 2  ;;  %v528_v48 = vrot.slane %v527_v43, 1 }
 0x967   :  { %v534_v47 = vadd.f32 %v533_v46, %v532_v45  ;;  %v529_v50 = vadd.f32 %v528_v48, %v527_v43 }
 0x969   :  { %v535_v49 = vrot.slane %v534_v47, 1 }
 0x96b   :  { %v536_v53 = vadd.f32 %v535_v49, %v534_v47 }
 0x96d   :  { %v3080_v54 = vsel %vm148_vm2, %v536_v53, %v529_v50 }
 0x96e   :  { %540 = vrot.lane.b32.xlu0 %v3080_v54, %s2837_s30 }
 0x972   :  { %543 = vrot.lane.b32.xlu0 %v3045_v31, %s2837_s30 }
 0x9e0   :  { %v541_v56 = vpop.permute.xlu0 %540 }
 0x9e1   :  { %v546_v58 = vsel %vm242_vm4, %v387_v57, %v541_v56 }
 0x9e4   :  { %v544_v61 = vpop.permute.xlu0 %543 }
 0x9e5   :  { %v547_v62 = vsel %vm244_vm5, %v546_v58, %v544_v61 }
 0x9e6   :  { %2370 = vmatmul.mubr.msk.f32.vlgmr.msra.gmra.mrb[0].mxu1 %vm257_vm6, %v547_v62 }
 0x9e7   :  { %2454 = vmatpush1.bf16.msra.mxu1 %v2958_v59  ;;  %1173 = vmatprep.mubr.f32.mxu1 %v2841_v35 }
 0x9e8   :  { %2456 = vmatprep.subr.bf16.mxu1 %v2960_v60 }
 0x9eb   :  { %2458 = vmatpush1.bf16.msra.mxu1 %v2965_v1 }
 0x9ec   :  { %2460 = vmatprep.subr.bf16.mxu1 %v2969_v2 }
 0x9ef   :  { %2462 = vmatpush1.bf16.msra.mxu1 %v2973_v10 }
 0x9f0   :  { %2464 = vmatprep.subr.bf16.mxu1 %v2977_v12 }
 0x9f3   :  { %2466 = vmatpush1.bf16.msra.mxu1 %v2981_v19 }
 0x9f4   :  { %2468 = vmatprep.subr.bf16.mxu1 %v2985_v20 }
 0x9f7   :  { %2470 = vmatpush1.bf16.msra.mxu1 %v2989_v23 }
 0x9f8   :  { %2492 = vmatprep.subr.bf16.mxu1 %v2956_v55 }
 0xab9   :  { %v617_v63 = vpop.f32.mrb[0].mxu1 }
 0xaba   :  { %v618_v0 = vadd.f32 %v617_v63, %v3027_v51  ;;  %v619_v3 = vpop.f32.mrb[1].mxu1 }
 0xabb   :  { %v620_v4 = vadd.f32 %v619_v3, %v3030_v52 }
 0xabc   :  { %623 = vrot.lane.b32.xlu0 %v618_v0, %s2833_s1 }
 0xac0   :  { %644 = vrot.lane.b32.xlu0 %v620_v4, %s2842_s11 }
 0xb2e   :  { %v624_v6 = vpop.permute.xlu0 %623 }
 0xb2f   :  { %v626_v7 = vadd.f32 %v624_v6, %v618_v0 }
 0xb31   :  { %v2371_v13 = vmul.f32 -1.442695, %v626_v7 }
 0xb32   :  { %v645_v18 = vpop.permute.xlu0 %644 }
 0xb33   :  { %2627 = vpow2.f32 %v2371_v13 }
 0xb3d   :  { %v2628_v9 = vpop.eup %2627 }
 0xb3e   :  { %v630_v15 = vadd.f32 1.0, %v2628_v9 }
 0xb40   :  { %2629 = vrcp.f32 %v630_v15 }
 0xb4a   :  { %v2630_v16 = vpop.eup %2629 }
 0xb4b   :  { %v647_v21 = vmul.f32 %v2630_v16, %v645_v18 }
 0xb4d   :  { %649 = vrot.lane.b32.xlu0 %v647_v21, %s2843_s4 }
 0xb51   :  { %634 = vrot.lane.b32.xlu0 %v620_v4, %s2833_s1 }
 0xbbf   :  { %v650_v22 = vpop.permute.xlu0 %649 }
 0xbc0   :  { %v652_v24 = vadd.f32 %v650_v22, %v618_v0 }
 0xbc2   :  { %2631 = vtanh.f32 %v652_v24 }
 0xbc3   :  { %v635_v26 = vpop.permute.xlu0 %634 }
 0xbc4   :  { %v637_v27 = vadd.f32 %v635_v26, %v618_v0 }
 0xbc6   :  { %v2372_v28 = vmul.f32 -1.442695, %v637_v27 }
 0xbc8   :  { %2633 = vpow2.f32 %v2372_v28 }
 0xbcc   :  { %v2632_v25 = vpop.eup %2631 }
 0xbcd   :  { %656 = vrot.lane.b32.xlu0 %v2632_v25, %s2842_s11 }
 0xbd2   :  { %v2634_v29 = vpop.eup %2633 }
 0xbd3   :  { %v641_v32 = vadd.f32 1.0, %v2634_v29 }
 0xbd5   :  { %2635 = vrcp.f32 %v641_v32 }
 0xbdf   :  { %v2636_v33 = vpop.eup %2635 }
 0xbe0   :  { %v654_v34 = vsub.f32 1.0, %v2636_v33  ;;  %v660_v38 = vmul.f32 %v2636_v33, %v3045_v31 }
 0xc3f   :  { %v657_v37 = vpop.permute.xlu0 %656 }
 0xc40   :  { %v659_v40 = vmul.f32 %v657_v37, %v654_v34 }
 0xc42   :  { %v3108_v41 = vadd.f32 %v660_v38, %v659_v40 }
 0xc44   :  { %v681_v42 = vrot.slane %v3108_v41, %v2921_v8 }
 0xc46   :  { %v689_v43 = vrot.slane %v681_v42, %v2921_v8  ;;  %v682_v45 = vcombine.high %v681_v42, %v681_v42 }
 0xc48   :  { %v700_v46 = vrot.slane %v689_v43, %v2927_v11  ;;  %v696_v47 = vrot.slane %v682_v45, %v2921_v8 }
 0xc4a   :  { %v707_v48 = vmul.f32 %v700_v46, %v3050_v36  ;;  %v704_v49 = vrot.slane %v696_v47, %v2927_v11 }
 0xc4c   :  { %711 = vrot.lane.b32.xlu1 %v707_v48, %s2842_s11  ;;  %v708_v50 = vmul.f32 %v704_v49, %v3054_v39 }
 0xc4e   :  { %713 = vrot.lane.b32.xlu0 %v708_v50, %s2842_s11 }
 0xcbe   :  { %v712_v53 = vpop.permute.xlu1 %711 }
 0xcbf   :  { %v717_v56 = vsel %vm129_vm1, %v712_v53, 0.0 }
 0xcc0   :  { %718 = vadd.xlane.f32.xlu0 %v717_v56  ;;  %v714_v57 = vpop.permute.xlu0 %713 }
 0xcc1   :  { %v720_v58 = vsel %vm129_vm1, %v714_v57, 0.0 }
 0xcc2   :  { %721 = vadd.xlane.f32.xlu1 %v720_v58 }
 0xd4d   :  { %v719_v61 = vpop.xlane.xlu0 %718 }
 0xd4e   :  { %v728_v63 = vrot.slane %v719_v61, %v2915_v5 }
 0xd4f   :  { %v722_v62 = vpop.xlane.xlu1 %721 }
 0xd50   :  { %v732_v0 = vrot.slane %v722_v62, %v2915_v5 }
 0xd52   :  { %v733_v3 = vsel %vm148_vm2, %v732_v0, %v728_v63 }
 0xd53   :  { %v735_v4 = vsel %vm151_vm3, %v733_v3, -inf }
 0xd54   :  { %736 = vmax.xlane.f32.xlu0 %v735_v4 }
 0xde1   :  { %v737_v6 = vpop.xlane.xlu0 %736 }
 0xde2   :  { %v742_v7 = vrot.slane %v737_v6, %v2927_v11  ;;  %v746_v13 = vrot.slane %v737_v6, %v2945_v30 }
 0xde4   :  { %v749_v9 = vsub.f32 %v719_v61, %v742_v7  ;;  %v750_v15 = vsub.f32 %v722_v62, %v746_v13  ;;  %v674_v13 = vld [vmem:[#allocation3 + $0x4] sm:$0x3] }
 0xde6   :  { %v751_v16 = vmul.f32 1.442695, %v749_v9  ;;  %v753_v18 = vmul.f32 1.442695, %v750_v15 }
 0xde8   :  { %2637 = vpow2.f32 %v751_v16 }
 0xde9   :  { %2639 = vpow2.f32 %v753_v18 }
 0xdf2   :  { %v2638_v21 = vpop.eup %2637 }
 0xdf3   :  { %v2640_v22 = vpop.eup %2639  ;;  %758 = vperm.xlu0 %2569, %v2638_v21  }
 0xdf4   :  { %761 = vperm.xlu1 %2568, %v2640_v22  }
 0xe72   :  { %v759_v24 = vpop.permute.xlu0 %758 }
 0xe73   :  { %v762_v25 = vpop.permute.xlu1 %761  ;;  %v766_v26 = vrot.slane %v759_v24, %v2915_v5 }
 0xe74   :  { %v770_v27 = vrot.slane %v762_v25, %v2915_v5 }
 0xe76   :  { %v771_v28 = vsel %vm148_vm2, %v770_v27, %v766_v26 }
 0xe77   :  { %v773_v29 = vsel %vm151_vm3, %v771_v28, 0.0 }
 0xe78   :  { %774 = vadd.xlane.f32.xlu0 %v773_v29 }
 0xf05   :  { %v775_v32 = vpop.xlane.xlu0 %774 }
 0xf06   :  { %2641 = vrcp.f32 %v775_v32 }
 0xf10   :  { %v2642_v33 = vpop.eup %2641 }
 0xf11   :  { %v781_v34 = vrot.slane %v2642_v33, %v2927_v11  ;;  %v785_v38 = vrot.slane %v2642_v33, %v2945_v30 }
 0xf13   :  { %v788_v37 = vmul.f32 %v2638_v21, %v781_v34  ;;  %v789_v40 = vmul.f32 %v2640_v22, %v785_v38 }
 0xf15   :  { %792 = vperm.xlu1 %2568, %v788_v37  }
 0xf19   :  { %797 = vperm.xlu1 %2568, %v789_v40  }
 0xf94   :  { %v793_v42 = vpop.permute.xlu1 %792 }
 0xf95   :  { %v800_v43 = vmul.f32 %v793_v42, %v2930_v14 }
 0xf97   :  { %v802_v45 = vsel %vm129_vm1, %v800_v43, 0.0 }
 0xf98   :  { %v803_v46 = vrot.slane %v802_v45, 4  ;;  %v798_v47 = vpop.permute.xlu1 %797 }
 0xf99   :  { %v801_v48 = vmul.f32 %v798_v47, %v2934_v17 }
 0xf9a   :  { %v804_v49 = vadd.f32 %v803_v46, %v802_v45 }
 0xf9b   :  { %v809_v50 = vsel %vm129_vm1, %v801_v48, 0.0 }
 0xf9c   :  { %v805_v53 = vrot.slane %v804_v49, 2  ;;  %v810_v56 = vrot.slane %v809_v50, 4 }
 0xf9e   :  { %v806_v57 = vadd.f32 %v805_v53, %v804_v49  ;;  %v811_v58 = vadd.f32 %v810_v56, %v809_v50 }
 0xfa0   :  { %v812_v61 = vrot.slane %v811_v58, 2  ;;  %v807_v63 = vrot.slane %v806_v57, 1 }
 0xfa2   :  { %v813_v62 = vadd.f32 %v812_v61, %v811_v58  ;;  %v808_v3 = vadd.f32 %v807_v63, %v806_v57 }
 0xfa4   :  { %v814_v0 = vrot.slane %v813_v62, 1 }
 0xfa6   :  { %v815_v4 = vadd.f32 %v814_v0, %v813_v62 }
 0xfa8   :  { %v3139_v6 = vsel %vm148_vm2, %v815_v4, %v808_v3 }
 0xfa9   :  { %819 = vrot.lane.b32.xlu1 %v3139_v6, %s2837_s30 }
 0xfad   :  { %822 = vrot.lane.b32.xlu1 %v3108_v41, %s2837_s30 }
0x101b   :  { %v820_v7 = vpop.permute.xlu1 %819 }
0x101c   :  { %v825_v9 = vsel %vm242_vm4, %v674_v13, %v820_v7 }
0x101f   :  { %v823_v15 = vpop.permute.xlu1 %822 }
0x1020   :  { %v826_v16 = vsel %vm244_vm5, %v825_v9, %v823_v15 }
0x1021   :  { %2373 = vmatmul.mubr.msk.f32.vlgmr.msra.gmra.mrb[2].mxu0 %vm257_vm6, %v826_v16 }
0x1022   :  { %2474 = vmatpush1.bf16.msra.mxu0 %v2958_v59  ;;  %1452 = vmatprep.mubr.f32.mxu0 %v2841_v35 }
0x1023   :  { %2476 = vmatprep.subr.bf16.mxu0 %v2960_v60 }
0x1026   :  { %2478 = vmatpush1.bf16.msra.mxu0 %v2965_v1 }
0x1027   :  { %2480 = vmatprep.subr.bf16.mxu0 %v2969_v2 }
0x102a   :  { %2482 = vmatpush1.bf16.msra.mxu0 %v2973_v10 }
0x102b   :  { %2484 = vmatprep.subr.bf16.mxu0 %v2977_v12 }
0x102e   :  { %2486 = vmatpush1.bf16.msra.mxu0 %v2981_v19 }
0x102f   :  { %2488 = vmatprep.subr.bf16.mxu0 %v2985_v20 }
0x1032   :  { %2490 = vmatpush1.bf16.msra.mxu0 %v2989_v23 }
0x1033   :  { %2512 = vmatprep.subr.bf16.mxu0 %v2956_v55 }
0x10f4   :  { %v896_v18 = vpop.f32.mrb[2].mxu0 }
0x10f5   :  { %v897_v21 = vadd.f32 %v896_v18, %v3027_v51  ;;  %v898_v22 = vpop.f32.mrb[3].mxu0 }
0x10f6   :  { %v899_v24 = vadd.f32 %v898_v22, %v3030_v52 }
0x10f7   :  { %902 = vrot.lane.b32.xlu1 %v897_v21, %s2833_s1 }
0x10fb   :  { %923 = vrot.lane.b32.xlu1 %v899_v24, %s2842_s11 }
0x10ff   :  { %913 = vrot.lane.b32.xlu1 %v899_v24, %s2833_s1 }
0x1169   :  { %v903_v25 = vpop.permute.xlu1 %902 }
0x116a   :  { %v905_v26 = vadd.f32 %v903_v25, %v897_v21 }
0x116c   :  { %v2374_v27 = vmul.f32 -1.442695, %v905_v26 }
0x116d   :  { %v924_v33 = vpop.permute.xlu1 %923 }
0x116e   :  { %2643 = vpow2.f32 %v2374_v27 }
0x1171   :  { %v914_v42 = vpop.permute.xlu1 %913 }
0x1172   :  { %v916_v43 = vadd.f32 %v914_v42, %v897_v21 }
0x1174   :  { %v2375_v45 = vmul.f32 -1.442695, %v916_v43 }
0x1178   :  { %v2644_v28 = vpop.eup %2643 }
0x1179   :  { %v909_v29 = vadd.f32 1.0, %v2644_v28 }
0x117b   :  { %2645 = vrcp.f32 %v909_v29 }
0x1185   :  { %v2646_v32 = vpop.eup %2645 }
0x1186   :  { %v926_v34 = vmul.f32 %v2646_v32, %v924_v33 }
0x1188   :  { %928 = vrot.lane.b32.xlu0 %v926_v34, %s2843_s4 }
0x11fa   :  { %v929_v37 = vpop.permute.xlu0 %928 }
0x11fb   :  { %v931_v38 = vadd.f32 %v929_v37, %v897_v21 }
0x11fd   :  { %2647 = vtanh.f32 %v931_v38 }
0x11fe   :  { %2649 = vpow2.f32 %v2375_v45 }
0x1207   :  { %v2648_v40 = vpop.eup %2647 }
0x1208   :  { %935 = vrot.lane.b32.xlu1 %v2648_v40, %s2842_s11  ;;  %v2650_v46 = vpop.eup %2649 }
0x1209   :  { %v920_v47 = vadd.f32 1.0, %v2650_v46 }
0x120b   :  { %2651 = vrcp.f32 %v920_v47 }
0x1215   :  { %v2652_v48 = vpop.eup %2651 }
0x1216   :  { %v933_v49 = vsub.f32 1.0, %v2652_v48  ;;  %v939_v53 = vmul.f32 %v2652_v48, %v3108_v41 }
0x127a   :  { %v936_v50 = vpop.permute.xlu1 %935 }
0x127b   :  { %v938_v56 = vmul.f32 %v936_v50, %v933_v49 }
0x127d   :  { %v3167_v57 = vadd.f32 %v939_v53, %v938_v56 }
0x127f   :  { %v960_v58 = vrot.slane %v3167_v57, %v2921_v8 }
0x1281   :  { %v968_v61 = vrot.slane %v960_v58, %v2921_v8  ;;  %v961_v62 = vcombine.high %v960_v58, %v960_v58 }
0x1283   :  { %v979_v63 = vrot.slane %v968_v61, %v2927_v11  ;;  %v975_v0 = vrot.slane %v961_v62, %v2921_v8 }
0x1285   :  { %v986_v3 = vmul.f32 %v979_v63, %v3050_v36  ;;  %v983_v4 = vrot.slane %v975_v0, %v2927_v11 }
0x1287   :  { %990 = vrot.lane.b32.xlu1 %v986_v3, %s2842_s11  ;;  %v987_v7 = vmul.f32 %v983_v4, %v3054_v39 }
0x128b   :  { %992 = vrot.lane.b32.xlu1 %v987_v7, %s2842_s11 }
0x12f9   :  { %v991_v13 = vpop.permute.xlu1 %990 }
0x12fa   :  { %v996_v9 = vsel %vm129_vm1, %v991_v13, 0.0 }
0x12fb   :  { %997 = vadd.xlane.f32.xlu1 %v996_v9 }
0x12fd   :  { %v993_v15 = vpop.permute.xlu1 %992 }
0x12fe   :  { %v999_v16 = vsel %vm129_vm1, %v993_v15, 0.0 }
0x12ff   :  { %1000 = vadd.xlane.f32.xlu0 %v999_v16 }
0x1388   :  { %v998_v18 = vpop.xlane.xlu1 %997 }
0x1389   :  { %v1007_v22 = vrot.slane %v998_v18, %v2915_v5 }
0x138c   :  { %v1001_v21 = vpop.xlane.xlu0 %1000 }
0x138d   :  { %v1011_v24 = vrot.slane %v1001_v21, %v2915_v5 }
0x138f   :  { %v1012_v25 = vsel %vm148_vm2, %v1011_v24, %v1007_v22 }
0x1390   :  { %v1014_v26 = vsel %vm151_vm3, %v1012_v25, -inf }
0x1391   :  { %1015 = vmax.xlane.f32.xlu1 %v1014_v26 }
0x141e   :  { %v1016_v27 = vpop.xlane.xlu1 %1015 }
0x141f   :  { %v1021_v28 = vrot.slane %v1016_v27, %v2927_v11  ;;  %v1025_v29 = vrot.slane %v1016_v27, %v2945_v30 }
0x1421   :  { %v1028_v32 = vsub.f32 %v998_v18, %v1021_v28  ;;  %v1029_v33 = vsub.f32 %v1001_v21, %v1025_v29  ;;  %v953_v29 = vld [vmem:[#allocation3 + $0x6] sm:$0x3] }
0x1423   :  { %v1030_v34 = vmul.f32 1.442695, %v1028_v32  ;;  %v1032_v37 = vmul.f32 1.442695, %v1029_v33 }
0x1425   :  { %2653 = vpow2.f32 %v1030_v34 }
0x1426   :  { %2655 = vpow2.f32 %v1032_v37 }
0x142f   :  { %v2654_v38 = vpop.eup %2653 }
0x1430   :  { %v2656_v40 = vpop.eup %2655  ;;  %1037 = vperm.xlu0 %2569, %v2654_v38  }
0x1431   :  { %1040 = vperm.xlu1 %2568, %v2656_v40  }
0x14af   :  { %v1038_v42 = vpop.permute.xlu0 %1037 }
0x14b0   :  { %v1041_v43 = vpop.permute.xlu1 %1040  ;;  %v1045_v45 = vrot.slane %v1038_v42, %v2915_v5 }
0x14b1   :  { %v1049_v46 = vrot.slane %v1041_v43, %v2915_v5 }
0x14b3   :  { %v1050_v47 = vsel %vm148_vm2, %v1049_v46, %v1045_v45 }
0x14b4   :  { %v1052_v48 = vsel %vm151_vm3, %v1050_v47, 0.0 }
0x14b5   :  { %1053 = vadd.xlane.f32.xlu1 %v1052_v48 }
0x1542   :  { %v1054_v49 = vpop.xlane.xlu1 %1053 }
0x1543   :  { %2657 = vrcp.f32 %v1054_v49 }
0x154d   :  { %v2658_v50 = vpop.eup %2657 }
0x154e   :  { %v1060_v53 = vrot.slane %v2658_v50, %v2927_v11  ;;  %v1064_v58 = vrot.slane %v2658_v50, %v2945_v30 }
0x1550   :  { %v1067_v56 = vmul.f32 %v2654_v38, %v1060_v53  ;;  %v1068_v61 = vmul.f32 %v2656_v40, %v1064_v58 }
0x1552   :  { %1071 = vperm.xlu0 %2569, %v1067_v56  }
0x1556   :  { %1076 = vperm.xlu0 %2569, %v1068_v61  }
0x15d1   :  { %v1072_v62 = vpop.permute.xlu0 %1071 }
0x15d2   :  { %v1079_v63 = vmul.f32 %v1072_v62, %v2930_v14 }
0x15d4   :  { %v1081_v0 = vsel %vm129_vm1, %v1079_v63, 0.0 }
0x15d5   :  { %v1082_v3 = vrot.slane %v1081_v0, 4  ;;  %v1077_v4 = vpop.permute.xlu0 %1076 }
0x15d6   :  { %v1080_v7 = vmul.f32 %v1077_v4, %v2934_v17 }
0x15d7   :  { %v1083_v13 = vadd.f32 %v1082_v3, %v1081_v0 }
0x15d8   :  { %v1088_v9 = vsel %vm129_vm1, %v1080_v7, 0.0 }
0x15d9   :  { %v1084_v15 = vrot.slane %v1083_v13, 2  ;;  %v1089_v16 = vrot.slane %v1088_v9, 4 }
0x15db   :  { %v1085_v18 = vadd.f32 %v1084_v15, %v1083_v13  ;;  %v1090_v21 = vadd.f32 %v1089_v16, %v1088_v9 }
0x15dd   :  { %v1091_v22 = vrot.slane %v1090_v21, 2  ;;  %v1086_v25 = vrot.slane %v1085_v18, 1 }
0x15df   :  { %v1092_v24 = vadd.f32 %v1091_v22, %v1090_v21  ;;  %v1087_v27 = vadd.f32 %v1086_v25, %v1085_v18 }
0x15e1   :  { %v1093_v26 = vrot.slane %v1092_v24, 1 }
0x15e3   :  { %v1094_v28 = vadd.f32 %v1093_v26, %v1092_v24 }
0x15e5   :  { %v3198_v14 = vsel %vm148_vm2, %v1094_v28, %v1087_v27 }
0x15e6   :  { %1098 = vrot.lane.b32.xlu0 %v3198_v14, %s2837_s30 }
0x15ea   :  { %1101 = vrot.lane.b32.xlu0 %v3167_v57, %s2837_s30 }
0x1658   :  { %v1099_v17 = vpop.permute.xlu0 %1098 }
0x1659   :  { %v1104_v32 = vsel %vm242_vm4, %v953_v29, %v1099_v17 }
0x165c   :  { %v1102_v33 = vpop.permute.xlu0 %1101 }
0x165d   :  { %v1105_v34 = vsel %vm244_vm5, %v1104_v32, %v1102_v33 }
0x165e   :  { %2376 = vmatmul.mubr.msk.f32.vlgmr.msra.gmra.mrb[2].mxu1 %vm257_vm6, %v1105_v34 }
0x165f   :  { %2494 = vmatpush1.bf16.msra.mxu1 %v2958_v59  ;;  %1731 = vmatprep.mubr.f32.mxu1 %v2841_v35 }
0x1660   :  { %2496 = vmatprep.subr.bf16.mxu1 %v2960_v60 }
0x1663   :  { %2498 = vmatpush1.bf16.msra.mxu1 %v2965_v1 }
0x1664   :  { %2500 = vmatprep.subr.bf16.mxu1 %v2969_v2 }
0x1667   :  { %2502 = vmatpush1.bf16.msra.mxu1 %v2973_v10 }
0x1668   :  { %2504 = vmatprep.subr.bf16.mxu1 %v2977_v12 }
0x166b   :  { %2506 = vmatpush1.bf16.msra.mxu1 %v2981_v19 }
0x166c   :  { %2508 = vmatprep.subr.bf16.mxu1 %v2985_v20 }
0x166f   :  { %2510 = vmatpush1.bf16.msra.mxu1 %v2989_v23 }
0x1670   :  { %2532 = vmatprep.subr.bf16.mxu1 %v2956_v55 }
0x1731   :  { %v1175_v37 = vpop.f32.mrb[2].mxu1 }
0x1732   :  { %v1176_v38 = vadd.f32 %v1175_v37, %v3027_v51  ;;  %v1177_v40 = vpop.f32.mrb[3].mxu1 }
0x1733   :  { %v1178_v42 = vadd.f32 %v1177_v40, %v3030_v52 }
0x1734   :  { %1181 = vrot.lane.b32.xlu0 %v1176_v38, %s2833_s1 }
0x1738   :  { %1202 = vrot.lane.b32.xlu0 %v1178_v42, %s2842_s11 }
0x17a6   :  { %v1182_v43 = vpop.permute.xlu0 %1181 }
0x17a7   :  { %v1184_v45 = vadd.f32 %v1182_v43, %v1176_v38 }
0x17a9   :  { %v2377_v46 = vmul.f32 -1.442695, %v1184_v45 }
0x17aa   :  { %v1203_v50 = vpop.permute.xlu0 %1202 }
0x17ab   :  { %2659 = vpow2.f32 %v2377_v46 }
0x17b5   :  { %v2660_v47 = vpop.eup %2659 }
0x17b6   :  { %v1188_v48 = vadd.f32 1.0, %v2660_v47 }
0x17b8   :  { %2661 = vrcp.f32 %v1188_v48 }
0x17c2   :  { %v2662_v49 = vpop.eup %2661 }
0x17c3   :  { %v1205_v55 = vmul.f32 %v2662_v49, %v1203_v50 }
0x17c5   :  { %1207 = vrot.lane.b32.xlu0 %v1205_v55, %s2843_s4 }
0x17c9   :  { %1192 = vrot.lane.b32.xlu0 %v1178_v42, %s2833_s1 }
0x1837   :  { %v1208_v53 = vpop.permute.xlu0 %1207 }
0x1838   :  { %v1210_v56 = vadd.f32 %v1208_v53, %v1176_v38 }
0x183a   :  { %2663 = vtanh.f32 %v1210_v56 }
0x183b   :  { %v1193_v61 = vpop.permute.xlu0 %1192 }
0x183c   :  { %v1195_v62 = vadd.f32 %v1193_v61, %v1176_v38 }
0x183e   :  { %v2378_v63 = vmul.f32 -1.442695, %v1195_v62 }
0x1840   :  { %2665 = vpow2.f32 %v2378_v63 }
0x1844   :  { %v2664_v58 = vpop.eup %2663 }
0x1845   :  { %1214 = vrot.lane.b32.xlu0 %v2664_v58, %s2842_s11 }
0x184a   :  { %v2666_v0 = vpop.eup %2665 }
0x184b   :  { %v1199_v3 = vadd.f32 1.0, %v2666_v0 }
0x184d   :  { %2667 = vrcp.f32 %v1199_v3 }
0x1857   :  { %v2668_v4 = vpop.eup %2667 }
0x1858   :  { %v1212_v7 = vsub.f32 1.0, %v2668_v4  ;;  %v1218_v9 = vmul.f32 %v2668_v4, %v3167_v57 }
0x18b7   :  { %v1215_v13 = vpop.permute.xlu0 %1214 }
0x18b8   :  { %v1217_v15 = vmul.f32 %v1215_v13, %v1212_v7 }
0x18ba   :  { %v3226_v16 = vadd.f32 %v1218_v9, %v1217_v15 }
0x18bc   :  { %v1239_v18 = vrot.slane %v3226_v16, %v2921_v8 }
0x18be   :  { %v1247_v21 = vrot.slane %v1239_v18, %v2921_v8  ;;  %v1240_v22 = vcombine.high %v1239_v18, %v1239_v18 }
0x18c0   :  { %v1258_v24 = vrot.slane %v1247_v21, %v2927_v11  ;;  %v1254_v25 = vrot.slane %v1240_v22, %v2921_v8  ;;  %v3252_v22 = vld [vmem:[#allocation6] sm:$0xff] }
0x18c2   :  { %v1265_v26 = vmul.f32 %v1258_v24, %v3050_v36  ;;  %v1262_v27 = vrot.slane %v1254_v25, %v2927_v11 }
0x18c4   :  { %1269 = vrot.lane.b32.xlu1 %v1265_v26, %s2842_s11  ;;  %v1266_v28 = vmul.f32 %v1262_v27, %v3054_v39 }
0x18c6   :  { %1271 = vrot.lane.b32.xlu0 %v1266_v28, %s2842_s11  ;;  %v3256_v28 = vld [vmem:[#allocation6 + $0x8] sm:$0xff] }
0x1936   :  { %v1270_v17 = vpop.permute.xlu1 %1269 }
0x1937   :  { %v1275_v29 = vsel %vm129_vm1, %v1270_v17, 0.0 }
0x1938   :  { %1276 = vadd.xlane.f32.xlu0 %v1275_v29  ;;  %v1272_v32 = vpop.permute.xlu0 %1271 }
0x1939   :  { %v1278_v33 = vsel %vm129_vm1, %v1272_v32, 0.0 }
0x193a   :  { %1279 = vadd.xlane.f32.xlu1 %v1278_v33 }
0x19c5   :  { %v1277_v34 = vpop.xlane.xlu0 %1276 }
0x19c6   :  { %v1286_v38 = vrot.slane %v1277_v34, %v2915_v5 }
0x19c7   :  { %v1280_v37 = vpop.xlane.xlu1 %1279 }
0x19c8   :  { %v1290_v40 = vrot.slane %v1280_v37, %v2915_v5 }
0x19ca   :  { %v1291_v42 = vsel %vm148_vm2, %v1290_v40, %v1286_v38 }
0x19cb   :  { %v1293_v43 = vsel %vm151_vm3, %v1291_v42, -inf }
0x19cc   :  { %1294 = vmax.xlane.f32.xlu0 %v1293_v43 }
0x1a59   :  { %v1295_v45 = vpop.xlane.xlu0 %1294 }
0x1a5a   :  { %v1300_v46 = vrot.slane %v1295_v45, %v2927_v11  ;;  %v1304_v47 = vrot.slane %v1295_v45, %v2945_v30 }
0x1a5c   :  { %v1307_v48 = vsub.f32 %v1277_v34, %v1300_v46  ;;  %v1308_v49 = vsub.f32 %v1280_v37, %v1304_v47 }
0x1a5e   :  { %v1309_v50 = vmul.f32 1.442695, %v1307_v48  ;;  %v1311_v55 = vmul.f32 1.442695, %v1308_v49 }
0x1a60   :  { %2669 = vpow2.f32 %v1309_v50  ;;  %v1232_v50 = vld [vmem:[#allocation3 + $0x8] sm:$0x3] }
0x1a61   :  { %2671 = vpow2.f32 %v1311_v55 }
0x1a6a   :  { %v2670_v53 = vpop.eup %2669 }
0x1a6b   :  { %v2672_v56 = vpop.eup %2671  ;;  %1316 = vperm.xlu0 %2569, %v2670_v53  }
0x1a6c   :  { %1319 = vperm.xlu1 %2568, %v2672_v56  }
0x1aea   :  { %v1317_v58 = vpop.permute.xlu0 %1316 }
0x1aeb   :  { %v1320_v61 = vpop.permute.xlu1 %1319  ;;  %v1324_v62 = vrot.slane %v1317_v58, %v2915_v5 }
0x1aec   :  { %v1328_v63 = vrot.slane %v1320_v61, %v2915_v5 }
0x1aee   :  { %v1329_v0 = vsel %vm148_vm2, %v1328_v63, %v1324_v62 }
0x1aef   :  { %v1331_v3 = vsel %vm151_vm3, %v1329_v0, 0.0 }
0x1af0   :  { %1332 = vadd.xlane.f32.xlu0 %v1331_v3 }
0x1b7d   :  { %v1333_v4 = vpop.xlane.xlu0 %1332 }
0x1b7e   :  { %2673 = vrcp.f32 %v1333_v4 }
0x1b88   :  { %v2674_v7 = vpop.eup %2673 }
0x1b89   :  { %v1339_v13 = vrot.slane %v2674_v7, %v2927_v11  ;;  %v1343_v15 = vrot.slane %v2674_v7, %v2945_v30 }
0x1b8b   :  { %v1346_v9 = vmul.f32 %v2670_v53, %v1339_v13  ;;  %v1347_v18 = vmul.f32 %v2672_v56, %v1343_v15 }
0x1b8d   :  { %1350 = vperm.xlu1 %2568, %v1346_v9  }
0x1b91   :  { %1355 = vperm.xlu1 %2568, %v1347_v18  }
0x1c0c   :  { %v1351_v21 = vpop.permute.xlu1 %1350 }
0x1c0d   :  { %v1358_v24 = vmul.f32 %v3252_v22, %v1351_v21 }
0x1c0f   :  { %v1360_v25 = vsel %vm129_vm1, %v1358_v24, 0.0 }
0x1c10   :  { %v1361_v26 = vrot.slane %v1360_v25, 4  ;;  %v1356_v27 = vpop.permute.xlu1 %1355 }
0x1c11   :  { %v1359_v17 = vmul.f32 %v3256_v28, %v1356_v27 }
0x1c12   :  { %v1362_v29 = vadd.f32 %v1361_v26, %v1360_v25 }
0x1c13   :  { %v1367_v32 = vsel %vm129_vm1, %v1359_v17, 0.0 }
0x1c14   :  { %v1363_v33 = vrot.slane %v1362_v29, 2  ;;  %v1368_v34 = vrot.slane %v1367_v32, 4 }
0x1c16   :  { %v1364_v37 = vadd.f32 %v1363_v33, %v1362_v29  ;;  %v1369_v38 = vadd.f32 %v1368_v34, %v1367_v32 }
0x1c18   :  { %v1370_v40 = vrot.slane %v1369_v38, 2  ;;  %v1365_v43 = vrot.slane %v1364_v37, 1 }
0x1c1a   :  { %v1371_v42 = vadd.f32 %v1370_v40, %v1369_v38  ;;  %v1366_v46 = vadd.f32 %v1365_v43, %v1364_v37 }
0x1c1c   :  { %v1372_v45 = vrot.slane %v1371_v42, 1 }
0x1c1e   :  { %v1373_v47 = vadd.f32 %v1372_v45, %v1371_v42 }
0x1c20   :  { %v3261_v48 = vsel %vm148_vm2, %v1373_v47, %v1366_v46 }
0x1c21   :  { %1377 = vrot.lane.b32.xlu1 %v3261_v48, %s2837_s30 }
0x1c25   :  { %1380 = vrot.lane.b32.xlu1 %v3226_v16, %s2837_s30 }
0x1c93   :  { %v1378_v49 = vpop.permute.xlu1 %1377 }
0x1c94   :  { %v1383_v55 = vsel %vm242_vm4, %v1232_v50, %v1378_v49 }
0x1c97   :  { %v1381_v53 = vpop.permute.xlu1 %1380 }
0x1c98   :  { %v1384_v56 = vsel %vm244_vm5, %v1383_v55, %v1381_v53 }
0x1c99   :  { %2379 = vmatmul.mubr.msk.f32.vlgmr.msra.gmra.mrb[4].mxu0 %vm257_vm6, %v1384_v56 }
0x1c9a   :  { %2514 = vmatpush1.bf16.msra.mxu0 %v2958_v59  ;;  %2010 = vmatprep.mubr.f32.mxu0 %v2841_v35 }
0x1c9b   :  { %2516 = vmatprep.subr.bf16.mxu0 %v2960_v60 }
0x1c9e   :  { %2518 = vmatpush1.bf16.msra.mxu0 %v2965_v1 }
0x1c9f   :  { %2520 = vmatprep.subr.bf16.mxu0 %v2969_v2 }
0x1ca2   :  { %2522 = vmatpush1.bf16.msra.mxu0 %v2973_v10 }
0x1ca3   :  { %2524 = vmatprep.subr.bf16.mxu0 %v2977_v12 }
0x1ca6   :  { %2526 = vmatpush1.bf16.msra.mxu0 %v2981_v19 }
0x1ca7   :  { %2528 = vmatprep.subr.bf16.mxu0 %v2985_v20 }
0x1caa   :  { %2530 = vmatpush1.bf16.msra.mxu0 %v2989_v23 }
0x1d6c   :  { %v1454_v58 = vpop.f32.mrb[4].mxu0 }
0x1d6d   :  { %v1455_v61 = vadd.f32 %v1454_v58, %v3027_v51  ;;  %v1456_v62 = vpop.f32.mrb[5].mxu0 }
0x1d6e   :  { %v1457_v63 = vadd.f32 %v1456_v62, %v3030_v52 }
0x1d6f   :  { %1460 = vrot.lane.b32.xlu1 %v1455_v61, %s2833_s1 }
0x1d73   :  { %1481 = vrot.lane.b32.xlu1 %v1457_v63, %s2842_s11 }
0x1d77   :  { %1471 = vrot.lane.b32.xlu1 %v1457_v63, %s2833_s1 }
0x1de1   :  { %v1461_v0 = vpop.permute.xlu1 %1460 }
0x1de2   :  { %v1463_v3 = vadd.f32 %v1461_v0, %v1455_v61 }
0x1de4   :  { %v2380_v4 = vmul.f32 -1.442695, %v1463_v3 }
0x1de5   :  { %v1482_v15 = vpop.permute.xlu1 %1481 }
0x1de6   :  { %2675 = vpow2.f32 %v2380_v4 }
0x1de9   :  { %v1472_v26 = vpop.permute.xlu1 %1471 }
0x1dea   :  { %v1474_v27 = vadd.f32 %v1472_v26, %v1455_v61 }
0x1dec   :  { %v2381_v17 = vmul.f32 -1.442695, %v1474_v27 }
0x1df0   :  { %v2676_v7 = vpop.eup %2675 }
0x1df1   :  { %v1467_v13 = vadd.f32 1.0, %v2676_v7 }
0x1df3   :  { %2677 = vrcp.f32 %v1467_v13 }
0x1dfd   :  { %v2678_v9 = vpop.eup %2677 }
0x1dfe   :  { %v1484_v18 = vmul.f32 %v2678_v9, %v1482_v15 }
0x1e00   :  { %1486 = vrot.lane.b32.xlu0 %v1484_v18, %s2843_s4 }
0x1e72   :  { %v1487_v21 = vpop.permute.xlu0 %1486 }
0x1e73   :  { %v1489_v24 = vadd.f32 %v1487_v21, %v1455_v61 }
0x1e75   :  { %2679 = vtanh.f32 %v1489_v24 }
0x1e76   :  { %2681 = vpow2.f32 %v2381_v17 }
0x1e7f   :  { %v2680_v25 = vpop.eup %2679 }
0x1e80   :  { %1493 = vrot.lane.b32.xlu1 %v2680_v25, %s2842_s11  ;;  %v2682_v29 = vpop.eup %2681 }
0x1e81   :  { %v1478_v32 = vadd.f32 1.0, %v2682_v29 }
0x1e83   :  { %2683 = vrcp.f32 %v1478_v32 }
0x1e8d   :  { %v2684_v33 = vpop.eup %2683 }
0x1e8e   :  { %v1491_v34 = vsub.f32 1.0, %v2684_v33  ;;  %v1497_v38 = vmul.f32 %v2684_v33, %v3226_v16 }
0x1ef2   :  { %v1494_v37 = vpop.permute.xlu1 %1493 }
0x1ef3   :  { %v1496_v40 = vmul.f32 %v1494_v37, %v1491_v34 }
0x1ef5   :  { %v3288_v42 = vadd.f32 %v1497_v38, %v1496_v40 }
0x1ef7   :  { %v1518_v43 = vrot.slane %v3288_v42, %v2921_v8 }
0x1ef9   :  { %v1526_v45 = vrot.slane %v1518_v43, %v2921_v8  ;;  %v1519_v46 = vcombine.high %v1518_v43, %v1518_v43 }
0x1efb   :  { %v1537_v47 = vrot.slane %v1526_v45, %v2927_v11  ;;  %v1533_v49 = vrot.slane %v1519_v46, %v2921_v8 }
0x1efd   :  { %v1544_v50 = vmul.f32 %v1537_v47, %v3050_v36  ;;  %v1541_v55 = vrot.slane %v1533_v49, %v2927_v11 }
0x1eff   :  { %1548 = vrot.lane.b32.xlu1 %v1544_v50, %s2842_s11  ;;  %v1545_v53 = vmul.f32 %v1541_v55, %v3054_v39 }
0x1f03   :  { %1550 = vrot.lane.b32.xlu1 %v1545_v53, %s2842_s11 }
0x1f71   :  { %v1549_v56 = vpop.permute.xlu1 %1548 }
0x1f72   :  { %v1554_v58 = vsel %vm129_vm1, %v1549_v56, 0.0 }
0x1f73   :  { %1555 = vadd.xlane.f32.xlu1 %v1554_v58 }
0x1f75   :  { %v1551_v61 = vpop.permute.xlu1 %1550 }
0x1f76   :  { %v1557_v62 = vsel %vm129_vm1, %v1551_v61, 0.0 }
0x1f77   :  { %1558 = vadd.xlane.f32.xlu0 %v1557_v62 }
0x2000   :  { %v1556_v63 = vpop.xlane.xlu1 %1555 }
0x2001   :  { %v1565_v3 = vrot.slane %v1556_v63, %v2915_v5 }
0x2004   :  { %v1559_v0 = vpop.xlane.xlu0 %1558 }
0x2005   :  { %v1569_v4 = vrot.slane %v1559_v0, %v2915_v5 }
0x2007   :  { %v1570_v7 = vsel %vm148_vm2, %v1569_v4, %v1565_v3 }
0x2008   :  { %v1572_v13 = vsel %vm151_vm3, %v1570_v7, -inf }
0x2009   :  { %1573 = vmax.xlane.f32.xlu1 %v1572_v13 }
0x2096   :  { %v1574_v9 = vpop.xlane.xlu1 %1573 }
0x2097   :  { %v1579_v15 = vrot.slane %v1574_v9, %v2927_v11  ;;  %v1583_v18 = vrot.slane %v1574_v9, %v2945_v30 }
0x2099   :  { %v1586_v21 = vsub.f32 %v1556_v63, %v1579_v15  ;;  %v1587_v24 = vsub.f32 %v1559_v0, %v1583_v18 }
0x209b   :  { %v1588_v25 = vmul.f32 1.442695, %v1586_v21  ;;  %v1590_v26 = vmul.f32 1.442695, %v1587_v24 }
0x209d   :  { %2685 = vpow2.f32 %v1588_v25 }
0x209e   :  { %2687 = vpow2.f32 %v1590_v26 }
0x20a7   :  { %v2686_v27 = vpop.eup %2685 }
0x20a8   :  { %v2688_v17 = vpop.eup %2687  ;;  %1595 = vperm.xlu0 %2569, %v2686_v27  }
0x20a9   :  { %1598 = vperm.xlu1 %2568, %v2688_v17  }
0x2127   :  { %v1596_v29 = vpop.permute.xlu0 %1595 }
0x2128   :  { %v1599_v32 = vpop.permute.xlu1 %1598  ;;  %v1603_v33 = vrot.slane %v1596_v29, %v2915_v5 }
0x2129   :  { %v1607_v34 = vrot.slane %v1599_v32, %v2915_v5 }
0x212b   :  { %v1608_v37 = vsel %vm148_vm2, %v1607_v34, %v1603_v33 }
0x212c   :  { %v1610_v38 = vsel %vm151_vm3, %v1608_v37, 0.0 }
0x212d   :  { %1611 = vadd.xlane.f32.xlu1 %v1610_v38 }
0x21ba   :  { %v1612_v40 = vpop.xlane.xlu1 %1611 }
0x21bb   :  { %2689 = vrcp.f32 %v1612_v40 }
0x21c5   :  { %v2690_v43 = vpop.eup %2689 }
0x21c6   :  { %v1618_v45 = vrot.slane %v2690_v43, %v2927_v11  ;;  %v1622_v47 = vrot.slane %v2690_v43, %v2945_v30 }
0x21c8   :  { %v1625_v46 = vmul.f32 %v2686_v27, %v1618_v45  ;;  %v1626_v49 = vmul.f32 %v2688_v17, %v1622_v47  ;;  %v1511_v27 = vld [vmem:[#allocation3 + $0xa] sm:$0x3] }
0x21ca   :  { %1629 = vperm.xlu0 %2569, %v1625_v46  }
0x21ce   :  { %1634 = vperm.xlu0 %2569, %v1626_v49  }
0x2249   :  { %v1630_v50 = vpop.permute.xlu0 %1629 }
0x224a   :  { %v1637_v55 = vmul.f32 %v3252_v22, %v1630_v50 }
0x224c   :  { %v1639_v53 = vsel %vm129_vm1, %v1637_v55, 0.0 }
0x224d   :  { %v1640_v56 = vrot.slane %v1639_v53, 4  ;;  %v1635_v58 = vpop.permute.xlu0 %1634 }
0x224e   :  { %v1638_v61 = vmul.f32 %v3256_v28, %v1635_v58 }
0x224f   :  { %v1641_v62 = vadd.f32 %v1640_v56, %v1639_v53 }
0x2250   :  { %v1646_v63 = vsel %vm129_vm1, %v1638_v61, 0.0 }
0x2251   :  { %v1642_v0 = vrot.slane %v1641_v62, 2  ;;  %v1647_v3 = vrot.slane %v1646_v63, 4 }
0x2253   :  { %v1643_v4 = vadd.f32 %v1642_v0, %v1641_v62  ;;  %v1648_v7 = vadd.f32 %v1647_v3, %v1646_v63 }
0x2255   :  { %v1649_v13 = vrot.slane %v1648_v7, 2  ;;  %v1644_v9 = vrot.slane %v1643_v4, 1 }
0x2257   :  { %v1650_v15 = vadd.f32 %v1649_v13, %v1648_v7  ;;  %v1645_v21 = vadd.f32 %v1644_v9, %v1643_v4 }
0x2259   :  { %v1651_v18 = vrot.slane %v1650_v15, 1 }
0x225b   :  { %v1652_v24 = vadd.f32 %v1651_v18, %v1650_v15 }
0x225d   :  { %v3319_v25 = vsel %vm148_vm2, %v1652_v24, %v1645_v21 }
0x225e   :  { %1656 = vrot.lane.b32.xlu0 %v3319_v25, %s2837_s30 }
0x2262   :  { %1659 = vrot.lane.b32.xlu0 %v3288_v42, %s2837_s30 }
0x22d0   :  { %v1657_v26 = vpop.permute.xlu0 %1656 }
0x22d1   :  { %v1662_v17 = vsel %vm242_vm4, %v1511_v27, %v1657_v26 }
0x22d4   :  { %v1660_v29 = vpop.permute.xlu0 %1659 }
0x22d5   :  { %v1663_v32 = vsel %vm244_vm5, %v1662_v17, %v1660_v29 }
0x22d6   :  { %2382 = vmatmul.mubr.msk.f32.vlgmr.msra.gmra.mrb[4].mxu1 %vm257_vm6, %v1663_v32 }
0x22d7   :  { %2534 = vmatpush1.bf16.msra.mxu1 %v2958_v59  ;;  %2289 = vmatprep.mubr.f32.mxu1 %v2841_v35 }
0x22d8   :  { %2536 = vmatprep.subr.bf16.mxu1 %v2960_v60 }
0x22db   :  { %2538 = vmatpush1.bf16.msra.mxu1 %v2965_v1 }
0x22dc   :  { %2540 = vmatprep.subr.bf16.mxu1 %v2969_v2 }
0x22df   :  { %2542 = vmatpush1.bf16.msra.mxu1 %v2973_v10 }
0x22e0   :  { %2544 = vmatprep.subr.bf16.mxu1 %v2977_v12 }
0x22e3   :  { %2546 = vmatpush1.bf16.msra.mxu1 %v2981_v19 }
0x22e4   :  { %2548 = vmatprep.subr.bf16.mxu1 %v2985_v20 }
0x22e7   :  { %2550 = vmatpush1.bf16.msra.mxu1 %v2989_v23 }
0x23a9   :  { %v1733_v33 = vpop.f32.mrb[4].mxu1 }
0x23aa   :  { %v1734_v59 = vadd.f32 %v1733_v33, %v3027_v51  ;;  %v1735_v35 = vpop.f32.mrb[5].mxu1 }
0x23ab   :  { %v1736_v60 = vadd.f32 %v1735_v35, %v3030_v52 }
0x23ac   :  { %1739 = vrot.lane.b32.xlu0 %v1734_v59, %s2833_s1 }
0x23b0   :  { %1760 = vrot.lane.b32.xlu0 %v1736_v60, %s2842_s11 }
0x241e   :  { %v1740_v1 = vpop.permute.xlu0 %1739 }
0x241f   :  { %v1742_v2 = vadd.f32 %v1740_v1, %v1734_v59 }
0x2421   :  { %v2383_v10 = vmul.f32 -1.442695, %v1742_v2 }
0x2422   :  { %v1761_v34 = vpop.permute.xlu0 %1760 }
0x2423   :  { %2691 = vpow2.f32 %v2383_v10 }
0x242d   :  { %v2692_v12 = vpop.eup %2691 }
0x242e   :  { %v1746_v19 = vadd.f32 1.0, %v2692_v12 }
0x2430   :  { %2693 = vrcp.f32 %v1746_v19 }
0x243a   :  { %v2694_v20 = vpop.eup %2693 }
0x243b   :  { %v1763_v23 = vmul.f32 %v2694_v20, %v1761_v34 }
0x243d   :  { %1765 = vrot.lane.b32.xlu0 %v1763_v23, %s2843_s4 }
0x2441   :  { %1750 = vrot.lane.b32.xlu0 %v1736_v60, %s2833_s1 }
0x24af   :  { %v1766_v37 = vpop.permute.xlu0 %1765 }
0x24b0   :  { %v1768_v38 = vadd.f32 %v1766_v37, %v1734_v59 }
0x24b2   :  { %2695 = vtanh.f32 %v1768_v38 }
0x24b3   :  { %v1751_v43 = vpop.permute.xlu0 %1750 }
0x24b4   :  { %v1753_v45 = vadd.f32 %v1751_v43, %v1734_v59 }
0x24b6   :  { %v2384_v46 = vmul.f32 -1.442695, %v1753_v45 }
0x24b8   :  { %2697 = vpow2.f32 %v2384_v46 }
0x24bc   :  { %v2696_v40 = vpop.eup %2695 }
0x24bd   :  { %1772 = vrot.lane.b32.xlu0 %v2696_v40, %s2842_s11 }
0x24c2   :  { %v2698_v47 = vpop.eup %2697 }
0x24c3   :  { %v1757_v49 = vadd.f32 1.0, %v2698_v47 }
0x24c5   :  { %2699 = vrcp.f32 %v1757_v49 }
0x24cf   :  { %v2700_v50 = vpop.eup %2699 }
0x24d0   :  { %v1770_v55 = vsub.f32 1.0, %v2700_v50  ;;  %v1776_v56 = vmul.f32 %v2700_v50, %v3288_v42 }
0x252f   :  { %v1773_v53 = vpop.permute.xlu0 %1772 }
0x2530   :  { %v1775_v58 = vmul.f32 %v1773_v53, %v1770_v55 }
0x2532   :  { %v3346_v61 = vadd.f32 %v1776_v56, %v1775_v58 }
0x2534   :  { %v1797_v62 = vrot.slane %v3346_v61, %v2921_v8 }
0x2536   :  { %v1805_v63 = vrot.slane %v1797_v62, %v2921_v8  ;;  %v1798_v0 = vcombine.high %v1797_v62, %v1797_v62 }
0x2538   :  { %v1816_v3 = vrot.slane %v1805_v63, %v2927_v11  ;;  %v1812_v4 = vrot.slane %v1798_v0, %v2921_v8 }
0x253a   :  { %v1823_v7 = vmul.f32 %v1816_v3, %v3050_v36  ;;  %v1820_v13 = vrot.slane %v1812_v4, %v2927_v11 }
0x253c   :  { %1827 = vrot.lane.b32.xlu1 %v1823_v7, %s2842_s11  ;;  %v1824_v9 = vmul.f32 %v1820_v13, %v3054_v39 }
0x253e   :  { %1829 = vrot.lane.b32.xlu0 %v1824_v9, %s2842_s11 }
0x25ae   :  { %v1828_v15 = vpop.permute.xlu1 %1827 }
0x25af   :  { %v1833_v18 = vsel %vm129_vm1, %v1828_v15, 0.0 }
0x25b0   :  { %1834 = vadd.xlane.f32.xlu0 %v1833_v18  ;;  %v1830_v21 = vpop.permute.xlu0 %1829 }
0x25b1   :  { %v1836_v24 = vsel %vm129_vm1, %v1830_v21, 0.0 }
0x25b2   :  { %1837 = vadd.xlane.f32.xlu1 %v1836_v24 }
0x263d   :  { %v1835_v26 = vpop.xlane.xlu0 %1834 }
0x263e   :  { %v1844_v17 = vrot.slane %v1835_v26, %v2915_v5 }
0x263f   :  { %v1838_v27 = vpop.xlane.xlu1 %1837 }
0x2640   :  { %v1848_v29 = vrot.slane %v1838_v27, %v2915_v5 }
0x2642   :  { %v1849_v32 = vsel %vm148_vm2, %v1848_v29, %v1844_v17 }
0x2643   :  { %v1851_v33 = vsel %vm151_vm3, %v1849_v32, -inf }
0x2644   :  { %1852 = vmax.xlane.f32.xlu0 %v1851_v33  ;;  %v1790_v33 = vld [vmem:[#allocation3 + $0xc] sm:$0x3] }
0x26d1   :  { %v1853_v59 = vpop.xlane.xlu0 %1852 }
0x26d2   :  { %v1858_v35 = vrot.slane %v1853_v59, %v2927_v11  ;;  %v1862_v60 = vrot.slane %v1853_v59, %v2945_v30 }
0x26d4   :  { %v1865_v1 = vsub.f32 %v1835_v26, %v1858_v35  ;;  %v1866_v2 = vsub.f32 %v1838_v27, %v1862_v60 }
0x26d6   :  { %v1867_v10 = vmul.f32 1.442695, %v1865_v1  ;;  %v1869_v12 = vmul.f32 1.442695, %v1866_v2 }
0x26d8   :  { %2701 = vpow2.f32 %v1867_v10 }
0x26d9   :  { %2703 = vpow2.f32 %v1869_v12 }
0x26e2   :  { %v2702_v19 = vpop.eup %2701 }
0x26e3   :  { %v2704_v20 = vpop.eup %2703  ;;  %1874 = vperm.xlu0 %2569, %v2702_v19  }
0x26e4   :  { %1877 = vperm.xlu1 %2568, %v2704_v20  }
0x2762   :  { %v1875_v34 = vpop.permute.xlu0 %1874 }
0x2763   :  { %v1878_v23 = vpop.permute.xlu1 %1877  ;;  %v1882_v37 = vrot.slane %v1875_v34, %v2915_v5 }
0x2764   :  { %v1886_v38 = vrot.slane %v1878_v23, %v2915_v5 }
0x2766   :  { %v1887_v40 = vsel %vm148_vm2, %v1886_v38, %v1882_v37 }
0x2767   :  { %v1889_v43 = vsel %vm151_vm3, %v1887_v40, 0.0 }
0x2768   :  { %1890 = vadd.xlane.f32.xlu0 %v1889_v43 }
0x27f5   :  { %v1891_v45 = vpop.xlane.xlu0 %1890 }
0x27f6   :  { %2705 = vrcp.f32 %v1891_v45 }
0x2800   :  { %v2706_v46 = vpop.eup %2705 }
0x2801   :  { %v1897_v47 = vrot.slane %v2706_v46, %v2927_v11  ;;  %v1901_v50 = vrot.slane %v2706_v46, %v2945_v30 }
0x2803   :  { %v1904_v49 = vmul.f32 %v2702_v19, %v1897_v47  ;;  %v1905_v55 = vmul.f32 %v2704_v20, %v1901_v50 }
0x2805   :  { %1908 = vperm.xlu1 %2568, %v1904_v49  }
0x2809   :  { %1913 = vperm.xlu1 %2568, %v1905_v55  }
0x2884   :  { %v1909_v53 = vpop.permute.xlu1 %1908 }
0x2885   :  { %v1916_v56 = vmul.f32 %v3252_v22, %v1909_v53 }
0x2887   :  { %v1918_v58 = vsel %vm129_vm1, %v1916_v56, 0.0 }
0x2888   :  { %v1919_v62 = vrot.slane %v1918_v58, 4  ;;  %v1914_v63 = vpop.permute.xlu1 %1913 }
0x2889   :  { %v1917_v0 = vmul.f32 %v3256_v28, %v1914_v63 }
0x288a   :  { %v1920_v3 = vadd.f32 %v1919_v62, %v1918_v58 }
0x288b   :  { %v1925_v4 = vsel %vm129_vm1, %v1917_v0, 0.0 }
0x288c   :  { %v1921_v7 = vrot.slane %v1920_v3, 2  ;;  %v1926_v13 = vrot.slane %v1925_v4, 4 }
0x288e   :  { %v1922_v9 = vadd.f32 %v1921_v7, %v1920_v3  ;;  %v1927_v15 = vadd.f32 %v1926_v13, %v1925_v4 }
0x2890   :  { %v1928_v18 = vrot.slane %v1927_v15, 2  ;;  %v1923_v21 = vrot.slane %v1922_v9, 1 }
0x2892   :  { %v1929_v24 = vadd.f32 %v1928_v18, %v1927_v15  ;;  %v1924_v27 = vadd.f32 %v1923_v21, %v1922_v9 }
0x2894   :  { %v1930_v26 = vrot.slane %v1929_v24, 1 }
0x2896   :  { %v1931_v17 = vadd.f32 %v1930_v26, %v1929_v24 }
0x2898   :  { %v3377_v29 = vsel %vm148_vm2, %v1931_v17, %v1924_v27 }
0x2899   :  { %1935 = vrot.lane.b32.xlu1 %v3377_v29, %s2837_s30 }
0x289d   :  { %1938 = vrot.lane.b32.xlu1 %v3346_v61, %s2837_s30 }
0x290b   :  { %v1936_v32 = vpop.permute.xlu1 %1935 }
0x290c   :  { %v1941_v59 = vsel %vm242_vm4, %v1790_v33, %v1936_v32 }
0x290f   :  { %v1939_v35 = vpop.permute.xlu1 %1938 }
0x2910   :  { %v1942_v60 = vsel %vm244_vm5, %v1941_v59, %v1939_v35 }
0x2911   :  { %2385 = vmatmul.mubr.msk.f32.vlgmr.msra.gmra.mrb[6].mxu0 %vm257_vm6, %v1942_v60 }
0x29e4   :  { %v2012_v1 = vpop.f32.mrb[6].mxu0 }
0x29e5   :  { %v2013_v2 = vadd.f32 %v2012_v1, %v3027_v51  ;;  %v2014_v10 = vpop.f32.mrb[7].mxu0 }
0x29e6   :  { %v2015_v12 = vadd.f32 %v2014_v10, %v3030_v52 }
0x29e7   :  { %2018 = vrot.lane.b32.xlu1 %v2013_v2, %s2833_s1 }
0x29eb   :  { %2039 = vrot.lane.b32.xlu1 %v2015_v12, %s2842_s11 }
0x29ef   :  { %2029 = vrot.lane.b32.xlu1 %v2015_v12, %s2833_s1 }
0x2a59   :  { %v2019_v19 = vpop.permute.xlu1 %2018 }
0x2a5a   :  { %v2021_v20 = vadd.f32 %v2019_v19, %v2013_v2 }
0x2a5c   :  { %v2386_v34 = vmul.f32 -1.442695, %v2021_v20 }
0x2a5d   :  { %v2040_v40 = vpop.permute.xlu1 %2039 }
0x2a5e   :  { %2707 = vpow2.f32 %v2386_v34 }
0x2a61   :  { %v2030_v49 = vpop.permute.xlu1 %2029 }
0x2a62   :  { %v2032_v50 = vadd.f32 %v2030_v49, %v2013_v2  ;;  %v2570_v49 = vpack.i.bf16 %v3108_v41, %v3045_v31 }
0x2a64   :  { %v2387_v55 = vmul.f32 -1.442695, %v2032_v50  ;;  %v2595_v50 = vpack.i.bf16 %v3319_v25, %v3261_v48 }
0x2a68   :  { %v2708_v23 = vpop.eup %2707 }
0x2a69   :  { %v2025_v37 = vadd.f32 1.0, %v2708_v23 }
0x2a6b   :  { %2709 = vrcp.f32 %v2025_v37 }
0x2a75   :  { %v2710_v38 = vpop.eup %2709 }
0x2a76   :  { %v2042_v43 = vmul.f32 %v2710_v38, %v2040_v40 }
0x2a78   :  { %2044 = vrot.lane.b32.xlu0 %v2042_v43, %s2843_s4 }
0x2aea   :  { %v2045_v45 = vpop.permute.xlu0 %2044 }
0x2aeb   :  { %v2047_v46 = vadd.f32 %v2045_v45, %v2013_v2 }
0x2aed   :  { %2711 = vtanh.f32 %v2047_v46 }
0x2aee   :  { %2713 = vpow2.f32 %v2387_v55 }
0x2af7   :  { %v2712_v47 = vpop.eup %2711 }
0x2af8   :  { %2051 = vrot.lane.b32.xlu1 %v2712_v47, %s2842_s11  ;;  %v2714_v53 = vpop.eup %2713 }
0x2af9   :  { %v2036_v56 = vadd.f32 1.0, %v2714_v53 }
0x2afb   :  { %2715 = vrcp.f32 %v2036_v56 }
0x2b05   :  { %v2716_v58 = vpop.eup %2715 }
0x2b06   :  { %v2049_v62 = vsub.f32 1.0, %v2716_v58  ;;  %v2055_v0 = vmul.f32 %v2716_v58, %v3346_v61 }
0x2b6a   :  { %v2052_v63 = vpop.permute.xlu1 %2051 }
0x2b6b   :  { %v2054_v3 = vmul.f32 %v2052_v63, %v2049_v62 }
0x2b6d   :  { %v3394_v4 = vadd.f32 %v2055_v0, %v2054_v3 }
0x2b6f   :  { %v2076_v7 = vrot.slane %v3394_v4, %v2921_v8 }
0x2b71   :  { %v2077_v13 = vcombine.high %v2076_v7, %v2076_v7  ;;  %v2084_v9 = vrot.slane %v2076_v7, %v2921_v8 }
0x2b73   :  { %v2095_v15 = vrot.slane %v2084_v9, %v2927_v11  ;;  %v2091_v18 = vrot.slane %v2077_v13, %v2921_v8 }
0x2b75   :  { %v2102_v21 = vmul.f32 %v2095_v15, %v3050_v36  ;;  %v2099_v24 = vrot.slane %v2091_v18, %v2927_v11 }
0x2b77   :  { %2106 = vrot.lane.b32.xlu1 %v2102_v21, %s2842_s11  ;;  %v2103_v26 = vmul.f32 %v2099_v24, %v3054_v39 }
0x2b7b   :  { %2108 = vrot.lane.b32.xlu1 %v2103_v26, %s2842_s11 }
0x2be9   :  { %v2107_v27 = vpop.permute.xlu1 %2106 }
0x2bea   :  { %v2112_v17 = vsel %vm129_vm1, %v2107_v27, 0.0 }
0x2beb   :  { %2113 = vadd.xlane.f32.xlu1 %v2112_v17 }
0x2bed   :  { %v2109_v32 = vpop.permute.xlu1 %2108 }
0x2bee   :  { %v2115_v33 = vsel %vm129_vm1, %v2109_v32, 0.0  ;;  %v2069_v32 = vld [vmem:[#allocation3 + $0xe] sm:$0x3] }
0x2bef   :  { %2116 = vadd.xlane.f32.xlu0 %v2115_v33 }
0x2c78   :  { %v2114_v59 = vpop.xlane.xlu1 %2113 }
0x2c79   :  { %v2123_v36 = vrot.slane %v2114_v59, %v2915_v5 }
0x2c7c   :  { %v2117_v8 = vpop.xlane.xlu0 %2116 }
0x2c7d   :  { %v2127_v35 = vrot.slane %v2117_v8, %v2915_v5 }
0x2c7f   :  { %v2128_v60 = vsel %vm148_vm2, %v2127_v35, %v2123_v36 }
0x2c80   :  { %v2130_v39 = vsel %vm151_vm3, %v2128_v60, -inf }
0x2c81   :  { %2131 = vmax.xlane.f32.xlu1 %v2130_v39 }
0x2d0e   :  { %v2132_v1 = vpop.xlane.xlu1 %2131 }
0x2d0f   :  { %v2137_v2 = vrot.slane %v2132_v1, %v2927_v11  ;;  %v2141_v10 = vrot.slane %v2132_v1, %v2945_v30 }
0x2d11   :  { %v2144_v12 = vsub.f32 %v2114_v59, %v2137_v2  ;;  %v2145_v19 = vsub.f32 %v2117_v8, %v2141_v10 }
0x2d13   :  { %v2146_v20 = vmul.f32 1.442695, %v2144_v12  ;;  %v2148_v34 = vmul.f32 1.442695, %v2145_v19 }
0x2d15   :  { %2717 = vpow2.f32 %v2146_v20 }
0x2d16   :  { %2719 = vpow2.f32 %v2148_v34 }
0x2d1f   :  { %v2718_v23 = vpop.eup %2717 }
0x2d20   :  { %v2720_v37 = vpop.eup %2719  ;;  %2153 = vperm.xlu0 %2569, %v2718_v23  }
0x2d21   :  { %2156 = vperm.xlu1 %2568, %v2720_v37  }
0x2d9f   :  { %v2154_v38 = vpop.permute.xlu0 %2153 }
0x2da0   :  { %v2157_v40 = vpop.permute.xlu1 %2156  ;;  %v2161_v43 = vrot.slane %v2154_v38, %v2915_v5  ;;  %v2580_v38 = vpack.i.bf16 %v3226_v16, %v3167_v57 }
0x2da1   :  { %v2165_v45 = vrot.slane %v2157_v40, %v2915_v5  ;;  %v2585_v40 = vpack.i.bf16 %v3198_v14, %v3139_v6 }
0x2da3   :  { %v2166_v46 = vsel %vm148_vm2, %v2165_v45, %v2161_v43  ;;  %v2590_v43 = vpack.i.bf16 %v3346_v61, %v3288_v42 }
0x2da4   :  { %v2168_v47 = vsel %vm151_vm3, %v2166_v46, 0.0 }
0x2da5   :  { %2169 = vadd.xlane.f32.xlu1 %v2168_v47 }
0x2db6   :  { %2571 = vrot.lane.b32.xlu1 %v2570_v49, %s2842_s11 }
0x2dba   :  { %2596 = vrot.lane.b32.xlu1 %v2595_v50, %s2833_s1 }
0x2e32   :  { %v2170_v55 = vpop.xlane.xlu1 %2169 }
0x2e33   :  { %2721 = vrcp.f32 %v2170_v55 }
0x2e36   :  { %v2572_v50 = vpop.permute.xlu1 %2571 }
0x2e37   :  { %v2574_v55 = vunpack.i.h.bf16 %v2572_v50 }
0x2e3d   :  { %v2722_v53 = vpop.eup %2721 }
0x2e3e   :  { %v2176_v5 = vrot.slane %v2722_v53, %v2927_v11  ;;  %v2180_v58 = vrot.slane %v2722_v53, %v2945_v30  ;;  %v2573_v53 = vunpack.i.l.bf16 %v2572_v50 }
0x2e40   :  { %v2183_v56 = vmul.f32 %v2718_v23, %v2176_v5  ;;  %v2184_v62 = vmul.f32 %v2720_v37, %v2180_v58  ;;  %v2575_v37 = vpack.i.bf16 %v3080_v54, %v3005_v44 }
0x2e42   :  { %2187 = vperm.xlu0 %2569, %v2183_v56  }
0x2e46   :  { %2192 = vperm.xlu0 %2569, %v2184_v62  }
0x2ec1   :  { %v2188_v63 = vpop.permute.xlu0 %2187 }
0x2ec2   :  { %v2195_v31 = vmul.f32 %v3252_v22, %v2188_v63 }
0x2ec4   :  { %v2197_v41 = vsel %vm129_vm1, %v2195_v31, 0.0 }
0x2ec5   :  { %v2198_v0 = vrot.slane %v2197_v41, 4  ;;  %v2193_v48 = vpop.permute.xlu0 %2192 }
0x2ec6   :  { %v2196_v25 = vmul.f32 %v3256_v28, %v2193_v48 }
0x2ec7   :  { %v2199_v3 = vadd.f32 %v2198_v0, %v2197_v41 }
0x2ec8   :  { %v2204_v7 = vsel %vm129_vm1, %v2196_v25, 0.0 }
0x2ec9   :  { %v2200_v13 = vrot.slane %v2199_v3, 2  ;;  %v2205_v11 = vrot.slane %v2204_v7, 4 }
0x2ecb   :  { %v2201_v9 = vadd.f32 %v2200_v13, %v2199_v3  ;;  %v2206_v15 = vadd.f32 %v2205_v11, %v2204_v7 }
0x2ecd   :  { %v2207_v30 = vrot.slane %v2206_v15, 2  ;;  %v2202_v18 = vrot.slane %v2201_v9, 1 }
0x2ecf   :  { %v2208_v21 = vadd.f32 %v2207_v30, %v2206_v15  ;;  %v2203_v26 = vadd.f32 %v2202_v18, %v2201_v9 }
0x2ed1   :  { %v2209_v24 = vrot.slane %v2208_v21, 1 }
0x2ed3   :  { %v2210_v27 = vadd.f32 %v2209_v24, %v2208_v21 }
0x2ed5   :  { %v2213_v22 = vsel %vm148_vm2, %v2210_v27, %v2203_v26 }
0x2ed6   :  { %v2600_v17 = vpack.i.bf16 %v2213_v22, %v3377_v29  ;;  %2214 = vrot.lane.b32.xlu0 %v2213_v22, %s2837_s30 }
0x2ed8   :  { %2601 = vrot.lane.b32.xlu1 %v2600_v17, %s2833_s1 }
0x2eda   :  { %2217 = vrot.lane.b32.xlu0 %v3394_v4, %s2837_s30 }
0x2f48   :  { %v2215_v28 = vpop.permute.xlu0 %2214 }
0x2f49   :  { %v2220_v33 = vsel %vm242_vm4, %v2069_v32, %v2215_v28 }
0x2f4c   :  { %v2218_v59 = vpop.permute.xlu0 %2217 }
0x2f4d   :  { %v2221_v8 = vsel %vm244_vm5, %v2220_v33, %v2218_v59 }
0x2f4e   :  { %2388 = vmatmul.mubr.msk.f32.vlgmr.msra.gmra.mrb[6].mxu1 %vm257_vm6, %v2221_v8 }
0x3021   :  { %v2291_v36 = vpop.f32.mrb[6].mxu1 }
0x3022   :  { %v2292_v35 = vadd.f32 %v2291_v36, %v3027_v51  ;;  %v2293_v29 = vpop.f32.mrb[7].mxu1 }
0x3023   :  { %v2294_v60 = vadd.f32 %v2293_v29, %v3030_v52 }
0x3024   :  { %2297 = vrot.lane.b32.xlu0 %v2292_v35, %s2833_s1 }
0x3028   :  { %2318 = vrot.lane.b32.xlu0 %v2294_v60, %s2842_s11 }
0x3096   :  { %v2298_v39 = vpop.permute.xlu0 %2297 }
0x3097   :  { %v2300_v1 = vadd.f32 %v2298_v39, %v2292_v35 }
0x3099   :  { %v2389_v2 = vmul.f32 -1.442695, %v2300_v1 }
0x309a   :  { %v2319_v20 = vpop.permute.xlu0 %2318 }
0x309b   :  { %2723 = vpow2.f32 %v2389_v2 }
0x30a5   :  { %v2724_v10 = vpop.eup %2723 }
0x30a6   :  { %v2304_v12 = vadd.f32 1.0, %v2724_v10 }
0x30a8   :  { %2725 = vrcp.f32 %v2304_v12 }
0x30b2   :  { %v2726_v19 = vpop.eup %2725 }
0x30b3   :  { %v2321_v34 = vmul.f32 %v2726_v19, %v2319_v20 }
0x30b5   :  { %2323 = vrot.lane.b32.xlu0 %v2321_v34, %s2843_s4 }
0x30b9   :  { %2308 = vrot.lane.b32.xlu0 %v2294_v60, %s2833_s1 }
0x3127   :  { %v2324_v51 = vpop.permute.xlu0 %2323 }
0x3128   :  { %v2326_v23 = vadd.f32 %v2324_v51, %v2292_v35 }
0x312a   :  { %2727 = vtanh.f32 %v2326_v23 }
0x312b   :  { %v2309_v44 = vpop.permute.xlu0 %2308 }
0x312c   :  { %v2311_v54 = vadd.f32 %v2309_v44, %v2292_v35 }
0x312e   :  { %v2390_v45 = vmul.f32 -1.442695, %v2311_v54 }
0x3130   :  { %2729 = vpow2.f32 %v2390_v45 }
0x3134   :  { %v2728_v52 = vpop.eup %2727 }
0x3135   :  { %2330 = vrot.lane.b32.xlu0 %v2728_v52, %s2842_s11 }
0x3139   :  { %2576 = vrot.lane.b32.xlu0 %v2575_v37, %s2833_s1 }
0x313a   :  { %v2730_v57 = vpop.eup %2729 }
0x313b   :  { %v2315_v16 = vadd.f32 1.0, %v2730_v57 }
0x313d   :  { %2581 = vrot.lane.b32.xlu0 %v2580_v38, %s2842_s11  ;;  %2731 = vrcp.f32 %v2315_v16 }
0x3141   :  { %2586 = vrot.lane.b32.xlu0 %v2585_v40, %s2833_s1 }
0x3145   :  { %2591 = vrot.lane.b32.xlu0 %v2590_v43, %s2842_s11 }
0x3147   :  { %v2732_v46 = vpop.eup %2731 }
0x3148   :  { %v2328_v47 = vsub.f32 1.0, %v2732_v46  ;;  %v2334_v14 = vmul.f32 %v2732_v46, %v3394_v4 }
0x3149   :  { %2058 = vrot.lane.b32.xlu0 %v3394_v4, %s2842_s11  ;;  %v2597_v4 = vpop.permute.xlu1 %2596 }
0x314a   :  { %v2599_v21 = vunpack.i.h.bf16 %v2597_v4  ;;  %v2598_v24 = vunpack.i.l.bf16 %v2597_v4 }
0x314d   :  { %v2602_v9 = vpop.permute.xlu1 %2601 }
0x314e   :  { %v2603_v22 = vunpack.i.l.bf16 %v2602_v9  ;;  %v2604_v35 = vunpack.i.h.bf16 %v2602_v9 }
0x31a7   :  { %v2331_v6 = vpop.permute.xlu0 %2330 }
0x31a8   :  { %v2333_v49 = vmul.f32 %v2331_v6, %v2328_v47 }
0x31aa   :  { %v2335_v42 = vadd.f32 %v2334_v14, %v2333_v49 }
0x31ab   :  { %v2577_v61 = vpop.permute.xlu0 %2576 }
0x31ac   :  { %v2579_v5 = vunpack.i.h.bf16 %v2577_v61  ;;  %v2578_v56 = vunpack.i.l.bf16 %v2577_v61  ;;  %2337 = vrot.lane.b32.xlu0 %v2335_v42, %s2842_s11 }
0x31ae   :  { %v382_v58 = vsel %vm129_vm1, %v2573_v53, %v2578_v56  ;;  %v669_v62 = vsel %vm129_vm1, %v2574_v55, %v2579_v5 }
0x31af   :  { %v383_v63 = vpack.c.bf16 %v382_v58, %v382_v58  ;;  %v670_v31 = vpack.c.bf16 %v669_v62, %v669_v62  ;;  %v2582_v41 = vpop.permute.xlu0 %2581 }
0x31b0   :  { %v2584_v48 = vunpack.i.h.bf16 %v2582_v41  ;;  %v2583_v25 = vunpack.i.l.bf16 %v2582_v41 }
0x31b1   :  { %385 = vst.msk [vmem:[#allocation9] sm:$0x1] %vm384_vm7, %v383_v63  ;;  %672 = vst.msk [vmem:[#allocation9 + $0x1] sm:$0x1] %vm384_vm7, %v670_v31 }
0x31b3   :  { %v2587_v0 = vpop.permute.xlu0 %2586 }
0x31b4   :  { %v2589_v3 = vunpack.i.h.bf16 %v2587_v0  ;;  %v2588_v7 = vunpack.i.l.bf16 %v2587_v0 }
0x31b6   :  { %v948_v13 = vsel %vm129_vm1, %v2583_v25, %v2588_v7  ;;  %v1227_v11 = vsel %vm129_vm1, %v2584_v48, %v2589_v3 }
0x31b7   :  { %v949_v15 = vpack.c.bf16 %v948_v13, %v948_v13  ;;  %v1228_v30 = vpack.c.bf16 %v1227_v11, %v1227_v11  ;;  %v2592_v18 = vpop.permute.xlu0 %2591 }
0x31b8   :  { %v2594_v26 = vunpack.i.h.bf16 %v2592_v18  ;;  %v2593_v27 = vunpack.i.l.bf16 %v2592_v18 }
0x31b9   :  { %951 = vst.msk [vmem:[#allocation9 + $0x2] sm:$0x1] %vm384_vm7, %v949_v15  ;;  %1230 = vst.msk [vmem:[#allocation9 + $0x3] sm:$0x1] %vm384_vm7, %v1228_v30 }
0x31ba   :  { %v1506_v17 = vsel %vm129_vm1, %v2593_v27, %v2598_v24  ;;  %v1785_v28 = vsel %vm129_vm1, %v2594_v26, %v2599_v21 }
0x31bb   :  { %v1507_v32 = vpack.c.bf16 %v1506_v17, %v1506_v17  ;;  %v1786_v33 = vpack.c.bf16 %v1785_v28, %v1785_v28  ;;  %v2059_v59 = vpop.permute.xlu0 %2058 }
0x31bc   :  { %v2064_v8 = vsel %vm129_vm1, %v2059_v59, %v2603_v22 }
0x31bd   :  { %1509 = vst.msk [vmem:[#allocation9 + $0x4] sm:$0x1] %vm384_vm7, %v1507_v32  ;;  %1788 = vst.msk [vmem:[#allocation9 + $0x5] sm:$0x1] %vm384_vm7, %v1786_v33  ;;  %v2065_v36 = vpack.c.bf16 %v2064_v8, %v2064_v8 }
0x31bf   :  { %2067 = vst.msk [vmem:[#allocation9 + $0x6] sm:$0x1] %vm384_vm7, %v2065_v36 }
0x321e   :  { %v2338_v29 = vpop.permute.xlu0 %2337 }
0x321f   :  { %v2343_v60 = vsel %vm129_vm1, %v2338_v29, %v2604_v35  ;;  %2348 = vst.msk [vmem:[#allocation2] sm:$0x3] %vm67_vm0, %v2338_v29 }
0x3220   :  { %v2344_v39 = vpack.c.bf16 %v2343_v60, %v2343_v60 }
0x3222   :  { %2346 = vst.msk [vmem:[#allocation9 + $0x7] sm:$0x1] %vm384_vm7, %v2344_v39 }
0x3223   :  { %2812 = shalt.err (!%p2809_p0)
}
0x3224   :  { %s2813_s1 = scalar_lea.hbm %s3498_s5, 128 }
0x3225   :  { %p2814_p1 = scmp.ne.s32.totalorder %s3498_s5, %s2813_s1  ;;  %p2817_p2 = scmp.lt.u32.totalorder %s2813_s1, %s3498_s5 }
0x3227   :  { %p2819_p3 = pnand %p2817_p2, %p2814_p1 }
0x3229   :  { %2822 = shalt.err (!%p2819_p3)
}
0x322a   :  { %s2845_s21 = smov 1  }
0x322b   :  { %2360 = dma.vmem_to_hbm [thread:$0]  %s2355_s13, 128, %s3498_s5, [#allocation5], %s2837_s30, %s2837_s30, %s2845_s21  }
0x322c   :  { %2827 = dma.done.wait [#allocation5], 128  }
0x322d   :  { %2828 = vsyncadd [#allocation5], 4294967168 }
0x322e   :  { %2364 = vsyncpa [#allocation4], 1 }
0x322f   :  { %2365 = vsyncpa [#allocation7], 1 }
0x3230   :  { %2366 = vsyncpa [#allocation5], 1 }

</bundles_post_ra>
